<compile_context>
chip_gen: v5e
topology: v5e:2x2
jax: 0.10.0
libtpu: 0.0.40
codegen_flags: <defaults>
</compile_context>

<pallas_src>
import jax
import jax.numpy as jnp
from jax.experimental import pallas as pl
from jax.experimental.pallas import tpu as pltpu


# --------------------------------------------------------------------------- #
# Pallas kernel: CIN + MLP + (precomputed) linear term, fused, batch-tiled.
# --------------------------------------------------------------------------- #
def make_xdeepfm_kernel(*, m, D, B_t, cin_kept, split_half, n_mlp_hidden):
    n_cin = len(cin_kept)

    def kernel(*refs):
        it = iter(refs)
        e2 = next(it)[...]                       # (B_t*D, m)  f32, CIN row layout
        ef = next(it)[...]                       # (B_t, m*D)  f32, MLP row layout
        lin = next(it)[...]                      # (B_t, 1)    f32, FeaturesLinear term
        cin_params = []
        for _kept in cin_kept:
            fws = [next(it)[...] for _ in range(m)]   # m x (H_prev, O)  bf16
            b = next(it)[...]                         # (1, O)           f32
            fcs = next(it)[...]                       # (1, kept)        f32
            cin_params.append((fws, b, fcs, _kept))
        fcb = next(it)[...]                      # (1, 1) f32 (CIN fc bias)
        mlp_params = [(next(it)[...], next(it)[...]) for _ in range(n_mlp_hidden)]
        w_last_t = next(it)[...]                 # (1, last_in) f32
        b_last = next(it)[...]                   # (1, 1) f32
        out_ref = next(it)                       # (B_t, 1)

        f32 = jnp.float32
        bf16 = jnp.bfloat16

        # ---------------- CIN (compressed interaction network) ----------------
        # x0 field columns stay f32 for the VPU broadcast-multiply.
        x0 = [e2[:, f:f + 1] for f in range(m)]          # each (B_t*D, 1), f32
        h = e2
        cin_acc = jnp.zeros((B_t, 1), f32)
        for li, (fws, b, fcs, kept) in enumerate(cin_params):
            hb = h.astype(bf16)                           # cast once per layer
            # (x0 ⊗ h) @ W  ==  sum_f x0[:,f] * (h @ W_f)   (field-major channels)
            acc = x0[0] * jnp.dot(hb, fws[0], preferred_element_type=f32)
            for f in range(1, m):
                acc = acc + x0[f] * jnp.dot(hb, fws[f], preferred_element_type=f32)
            z = jnp.maximum(acc + b, 0.0)                  # (B_t*D, O), ReLU
            if split_half and li != n_cin - 1:
                zk = z[:, :kept]                           # kept half -> output path
                h = z[:, kept:]                            # second half -> next layer
            else:
                zk = z
                h = z
            # pool over embed dim (rows b*D+d); lane dim unchanged -> tile-safe
            pooled = jnp.sum(zk.reshape(B_t, D, kept), axis=1)        # (B_t, kept)
            # fold CIN fc:  cin_out += pooled @ fcw[off:off+kept]  (VPU, no N=1 MXU)
            cin_acc = cin_acc + jnp.sum(pooled * fcs, axis=1, keepdims=True)
        cin_out = cin_acc + fcb                            # (B_t, 1)

        # ---------------- MLP (eval mode, BN folded, dropout = id) ------------
        hdd = ef
        for (w, bb) in mlp_params:
            hdd = jnp.dot(hdd.astype(bf16), w, preferred_element_type=f32) + bb
            hdd = jnp.maximum(hdd, 0.0)
        # final (hidden, 1) projection as VPU mul + lane reduction (no N=1 MXU pass)
        mlp_out = jnp.sum(hdd * w_last_t, axis=1, keepdims=True) + b_last   # (B_t, 1)

        out_ref[...] = lin + cin_out + mlp_out

    return kernel


# --------------------------------------------------------------------------- #
# Wrapper: embedding gathers / weight prep in plain JAX, hot path in the kernel.
# --------------------------------------------------------------------------- #
def xdeepfm_forward(user, item, params, *, num_fields, factor_num,
                    cross_layer_sizes, split_half, mlp_dims, batch_tile=None):
    B = user.shape[0]
    D = factor_num
    m = num_fields
    B_t = batch_tile if batch_tile is not None else B
    assert B % B_t == 0, "batch must be divisible by batch_tile"

    # ---- glue: embedding gathers + FeaturesLinear term --------------------
    idx = jnp.stack([user, item], axis=1) + params["offsets"][None, :]      # (B, m)
    embed_x = params["emb_table"][idx]                                       # (B, m, D)
    lin = jnp.sum(params["lin_table"][idx], axis=1) + params["lin_bias"]     # (B, 1)

    # ---- glue: layouts for the kernel --------------------------------------
    e2 = jnp.transpose(embed_x, (0, 2, 1)).reshape(B * D, m)    # rows = b*D + d
    ef = embed_x.reshape(B, m * D)                              # rows = b, cols = f*D + d

    # ---- glue: CIN weight prep (split per field, bf16 for MXU) -------------
    fcw = params["cin_fc_w"]                                    # (fc_in, 1)
    n_cin = len(cross_layer_sizes)
    cin_inputs = []
    cin_kept = []
    H_prev, off = m, 0
    for i, (wt, b) in enumerate(params["cin"]):
        O = wt.shape[1]
        field_ws = [wt[f * H_prev:(f + 1) * H_prev, :].astype(jnp.bfloat16)
                    for f in range(m)]
        if split_half and i != n_cin - 1:
            kept = O // 2
        else:
            kept = O
        H_prev = kept
        fc_slice = fcw[off:off + kept, :].T                     # (1, kept) f32
        off += kept
        cin_kept.append(kept)
        cin_inputs += field_ws + [b, fc_slice]

    # ---- glue: MLP weight prep (hidden -> bf16, last -> transposed f32) ----
    mlp_hidden = [(w.astype(jnp.bfloat16), b) for (w, b) in params["mlp"][:-1]]
    w_last, b_last = params["mlp"][-1]
    w_last_t = w_last.T                                          # (1, in)

    inputs = [e2, ef, lin] + cin_inputs + [params["cin_fc_b"]]
    for w, b in mlp_hidden:
        inputs += [w, b]
    inputs += [w_last_t, b_last]

    # ---- block specs --------------------------------------------------------
    def const_spec(x):
        nd = x.ndim
        return pl.BlockSpec(x.shape, lambda i, _nd=nd: (0,) * _nd)

    in_specs = [
        pl.BlockSpec((B_t * D, m), lambda i: (i, 0)),            # e2 batch tile
        pl.BlockSpec((B_t, m * D), lambda i: (i, 0)),            # ef batch tile
        pl.BlockSpec((B_t, 1), lambda i: (i, 0)),                # linear term
    ] + [const_spec(x) for x in inputs[3:]]                      # weights resident
    out_spec = pl.BlockSpec((B_t, 1), lambda i: (i, 0))

    # ---- cost estimate ------------------------------------------------------
    flops = 0
    H_prev = m
    for i, O in enumerate(cross_layer_sizes):
        flops += 2 * B * D * m * H_prev * O                      # CIN matmuls
        H_prev = O // 2 if (split_half and i != n_cin - 1) else O
    dims = [m * D] + list(mlp_dims) + [1]
    for a, b_ in zip(dims[:-1], dims[1:]):
        flops += 2 * B * a * b_                                  # MLP matmuls
    bytes_accessed = sum(int(x.size) * x.dtype.itemsize for x in inputs) + B * 4
    cost = pl.CostEstimate(flops=int(flops), transcendentals=0,
                           bytes_accessed=int(bytes_accessed))

    kernel = make_xdeepfm_kernel(m=m, D=D, B_t=B_t, cin_kept=cin_kept,
                                 split_half=split_half,
                                 n_mlp_hidden=len(mlp_hidden))

    out = pl.pallas_call(
        kernel,
        out_shape=jax.ShapeDtypeStruct((B, 1), jnp.float32),
        grid=(B // B_t,),
        in_specs=in_specs,
        out_specs=out_spec,
        compiler_params=pltpu.CompilerParams(
            dimension_semantics=("parallel",),      # megacore-shardable batch axis
            vmem_limit_bytes=32 * 1024 * 1024,      # fits v5e/v6e/v7x comfortably
        ),
        cost_estimate=cost,
    )(*inputs)
    return out[:, 0]     # == x.squeeze(1) in PyTorch (logits=True path)


# --------------------------------------------------------------------------- #
# Deterministic parameter init (shapes follow the PyTorch module __init__).
# --------------------------------------------------------------------------- #
def init_params(key, user_num, item_num, factor_num, mlp_dims,
                cross_layer_sizes, split_half):
    num_fields = 2
    D = factor_num
    keys = iter(jax.random.split(key, 16))
    total = user_num + item_num

    emb_table = jax.random.normal(next(keys), (total, D), jnp.float32) * 0.1
    lin_table = jax.random.normal(next(keys), (total, 1), jnp.float32) * 0.1
    lin_bias = jnp.zeros((1,), jnp.float32)
    offsets = jnp.array([0, user_num], jnp.int32)

    # CIN conv1d(kernel_size=1) weights, stored transposed as (in_ch, out_ch).
    cin = []
    prev_dim, fc_in = num_fields, 0
    for i, cls in enumerate(cross_layer_sizes):
        in_ch = num_fields * prev_dim
        w = jax.random.normal(next(keys), (in_ch, cls), jnp.float32) / jnp.sqrt(float(in_ch))
        b = jax.random.normal(next(keys), (1, cls), jnp.float32) * 0.01
        cin.append((w, b))
        if split_half and i != len(cross_layer_sizes) - 1:
            cls //= 2
        prev_dim = cls
        fc_in += prev_dim
    cin_fc_w = jax.random.normal(next(keys), (fc_in, 1), jnp.float32) / jnp.sqrt(float(fc_in))
    cin_fc_b = jnp.zeros((1, 1), jnp.float32)

    # MLP linears, transposed as (in, out); eval-mode BN folded in.
    bn_scale = 1.0 / jnp.sqrt(1.0 + 1e-5)      # running_mean=0, running_var=1, gamma=1, beta=0
    # TODO(synk): fold trained BN running stats here if loading a real checkpoint.
    mlp = []
    in_dim = num_fields * D
    for hdim in mlp_dims:
        w = jax.random.normal(next(keys), (in_dim, hdim), jnp.float32) / jnp.sqrt(float(in_dim))
        b = jax.random.normal(next(keys), (1, hdim), jnp.float32) * 0.01
        mlp.append((w * bn_scale, b * bn_scale))
        in_dim = hdim
    w = jax.random.normal(next(keys), (in_dim, 1), jnp.float32) / jnp.sqrt(float(in_dim))
    mlp.append((w, jnp.zeros((1, 1), jnp.float32)))

    return dict(emb_table=emb_table, lin_table=lin_table, lin_bias=lin_bias,
                offsets=offsets, cin=cin, cin_fc_w=cin_fc_w, cin_fc_b=cin_fc_b,
                mlp=mlp)


# --------------------------------------------------------------------------- #
# Pure-JAX reference (mirrors the PyTorch forward) for validation.
# --------------------------------------------------------------------------- #
def reference_forward(user, item, params, *, cross_layer_sizes, split_half):
    idx = jnp.stack([user, item], axis=1) + params["offsets"][None, :]
    e = params["emb_table"][idx]                                        # (B, m, D)
    lin = jnp.sum(params["lin_table"][idx], axis=1) + params["lin_bias"]
    B, m, D = e.shape

    h = e
    kept = []
    n_cin = len(params["cin"])
    for i, (wt, b) in enumerate(params["cin"]):
        xc = (e[:, :, None, :] * h[:, None, :, :]).reshape(B, -1, D)    # (B, m*H, D)
        z = jax.nn.relu(jnp.einsum('bcd,co->bod', xc, wt) + b[0][None, :, None])
        if split_half and i != n_cin - 1:
            half = z.shape[1] // 2
            kept.append(z[:, :half]); h = z[:, half:]
        else:
            kept.append(z); h = z
    s = jnp.sum(jnp.concatenate(kept, axis=1), axis=2)
    cin_out = s @ params["cin_fc_w"] + params["cin_fc_b"]

    hdd = e.reshape(B, m * D)
    n_mlp = len(params["mlp"])
    for i, (w, b) in enumerate(params["mlp"]):
        hdd = hdd @ w + b
        if i != n_mlp - 1:
            hdd = jax.nn.relu(hdd)
    return (lin + cin_out + hdd)[:, 0]


if __name__ == "__main__":
    user_num, item_num, factor_num = 32, 48, 16
    mlp_dims = (32, 16)
    dropout = 0.2                     # identity at inference
    cross_layer_sizes = (8, 8)
    split_half = True
    B = 16                            # batch
    batch_tile = 8                    # grid=(2,); B_t * D = 128 rows per CIN tile

    key = jax.random.PRNGKey(0)
    kp, ku, ki = jax.random.split(key, 3)
    params = init_params(kp, user_num, item_num, factor_num, mlp_dims,
                         cross_layer_sizes, split_half)
    user = jax.random.randint(ku, (B,), 0, user_num, dtype=jnp.int32)
    item = jax.random.randint(ki, (B,), 0, item_num, dtype=jnp.int32)
    # `features` is accepted but unused by the PyTorch forward; kept for parity.
    features = jnp.zeros((B, 4), jnp.float32)

    out = xdeepfm_forward(user, item, params, num_fields=2, factor_num=factor_num,
                          cross_layer_sizes=cross_layer_sizes,
                          split_half=split_half, mlp_dims=mlp_dims,
                          batch_tile=batch_tile)
    out = jax.block_until_ready(out)

    ref = reference_forward(user, item, params,
                            cross_layer_sizes=cross_layer_sizes, split_half=split_half)
    assert out.shape == (B,)
    assert jnp.allclose(out, ref, rtol=5e-2, atol=5e-2), (out, ref)
    print("KERNEL_OK")
</pallas_src>

<mosaic_0001>
module attributes {stable_mosaic.version = 11 : i64} {
  func.func @kernel(%arg0: i32, %arg1: memref<128x2xf32, #tpu.memory_space<vmem>>, %arg2: memref<8x32xf32, #tpu.memory_space<vmem>>, %arg3: memref<8x1xf32, #tpu.memory_space<vmem>>, %arg4: memref<2x8xbf16, #tpu.memory_space<vmem>>, %arg5: memref<2x8xbf16, #tpu.memory_space<vmem>>, %arg6: memref<1x8xf32, #tpu.memory_space<vmem>>, %arg7: memref<1x4xf32, #tpu.memory_space<vmem>>, %arg8: memref<4x8xbf16, #tpu.memory_space<vmem>>, %arg9: memref<4x8xbf16, #tpu.memory_space<vmem>>, %arg10: memref<1x8xf32, #tpu.memory_space<vmem>>, %arg11: memref<1x8xf32, #tpu.memory_space<vmem>>, %arg12: memref<1x1xf32, #tpu.memory_space<vmem>>, %arg13: memref<32x32xbf16, #tpu.memory_space<vmem>>, %arg14: memref<1x32xf32, #tpu.memory_space<vmem>>, %arg15: memref<32x16xbf16, #tpu.memory_space<vmem>>, %arg16: memref<1x16xf32, #tpu.memory_space<vmem>>, %arg17: memref<1x16xf32, #tpu.memory_space<vmem>>, %arg18: memref<1x1xf32, #tpu.memory_space<vmem>>, %arg19: memref<8x1xf32, #tpu.memory_space<vmem>>) attributes {dimension_semantics = [#tpu.dimension_semantics<parallel>], iteration_bounds = array<i64: 2>, scalar_prefetch = 0 : i64, scratch_operands = 0 : i64, tpu.core_type = #tpu.core_type<tc>, window_params = [{transform_indices = @transform_0, window_bounds = array<i64: 128, 2>}, {transform_indices = @transform_1, window_bounds = array<i64: 8, 32>}, {transform_indices = @transform_2, window_bounds = array<i64: 8, 1>}, {pipeline_mode = #tpu.pipeline_mode<synchronous>, transform_indices = @transform_3, window_bounds = array<i64: 2, 8>}, {pipeline_mode = #tpu.pipeline_mode<synchronous>, transform_indices = @transform_4, window_bounds = array<i64: 2, 8>}, {pipeline_mode = #tpu.pipeline_mode<synchronous>, transform_indices = @transform_5, window_bounds = array<i64: 1, 8>}, {pipeline_mode = #tpu.pipeline_mode<synchronous>, transform_indices = @transform_6, window_bounds = array<i64: 1, 4>}, {pipeline_mode = #tpu.pipeline_mode<synchronous>, transform_indices = @transform_7, window_bounds = array<i64: 4, 8>}, {pipeline_mode = #tpu.pipeline_mode<synchronous>, transform_indices = @transform_8, window_bounds = array<i64: 4, 8>}, {pipeline_mode = #tpu.pipeline_mode<synchronous>, transform_indices = @transform_9, window_bounds = array<i64: 1, 8>}, {pipeline_mode = #tpu.pipeline_mode<synchronous>, transform_indices = @transform_10, window_bounds = array<i64: 1, 8>}, {pipeline_mode = #tpu.pipeline_mode<synchronous>, transform_indices = @transform_11, window_bounds = array<i64: 1, 1>}, {pipeline_mode = #tpu.pipeline_mode<synchronous>, transform_indices = @transform_12, window_bounds = array<i64: 32, 32>}, {pipeline_mode = #tpu.pipeline_mode<synchronous>, transform_indices = @transform_13, window_bounds = array<i64: 1, 32>}, {pipeline_mode = #tpu.pipeline_mode<synchronous>, transform_indices = @transform_14, window_bounds = array<i64: 32, 16>}, {pipeline_mode = #tpu.pipeline_mode<synchronous>, transform_indices = @transform_15, window_bounds = array<i64: 1, 16>}, {pipeline_mode = #tpu.pipeline_mode<synchronous>, transform_indices = @transform_16, window_bounds = array<i64: 1, 16>}, {pipeline_mode = #tpu.pipeline_mode<synchronous>, transform_indices = @transform_17, window_bounds = array<i64: 1, 1>}, {transform_indices = @transform_18, window_bounds = array<i64: 8, 1>}]} {
    %c0 = arith.constant 0 : index
    %c0_0 = arith.constant 0 : index
    %0 = vector.load %arg1[%c0, %c0_0] : memref<128x2xf32, #tpu.memory_space<vmem>>, vector<128x2xf32>
    %c0_1 = arith.constant 0 : index
    %c0_2 = arith.constant 0 : index
    %1 = vector.load %arg2[%c0_1, %c0_2] : memref<8x32xf32, #tpu.memory_space<vmem>>, vector<8x32xf32>
    %c0_3 = arith.constant 0 : index
    %c0_4 = arith.constant 0 : index
    %2 = vector.load %arg3[%c0_3, %c0_4] : memref<8x1xf32, #tpu.memory_space<vmem>>, vector<8x1xf32>
    %c0_5 = arith.constant 0 : index
    %c0_6 = arith.constant 0 : index
    %3 = vector.load %arg4[%c0_5, %c0_6] : memref<2x8xbf16, #tpu.memory_space<vmem>>, vector<2x8xbf16>
    %c0_7 = arith.constant 0 : index
    %c0_8 = arith.constant 0 : index
    %4 = vector.load %arg5[%c0_7, %c0_8] : memref<2x8xbf16, #tpu.memory_space<vmem>>, vector<2x8xbf16>
    %c0_9 = arith.constant 0 : index
    %c0_10 = arith.constant 0 : index
    %5 = vector.load %arg6[%c0_9, %c0_10] : memref<1x8xf32, #tpu.memory_space<vmem>>, vector<1x8xf32>
    %c0_11 = arith.constant 0 : index
    %c0_12 = arith.constant 0 : index
    %6 = vector.load %arg7[%c0_11, %c0_12] : memref<1x4xf32, #tpu.memory_space<vmem>>, vector<1x4xf32>
    %c0_13 = arith.constant 0 : index
    %c0_14 = arith.constant 0 : index
    %7 = vector.load %arg8[%c0_13, %c0_14] : memref<4x8xbf16, #tpu.memory_space<vmem>>, vector<4x8xbf16>
    %c0_15 = arith.constant 0 : index
    %c0_16 = arith.constant 0 : index
    %8 = vector.load %arg9[%c0_15, %c0_16] : memref<4x8xbf16, #tpu.memory_space<vmem>>, vector<4x8xbf16>
    %c0_17 = arith.constant 0 : index
    %c0_18 = arith.constant 0 : index
    %9 = vector.load %arg10[%c0_17, %c0_18] : memref<1x8xf32, #tpu.memory_space<vmem>>, vector<1x8xf32>
    %c0_19 = arith.constant 0 : index
    %c0_20 = arith.constant 0 : index
    %10 = vector.load %arg11[%c0_19, %c0_20] : memref<1x8xf32, #tpu.memory_space<vmem>>, vector<1x8xf32>
    %c0_21 = arith.constant 0 : index
    %c0_22 = arith.constant 0 : index
    %11 = vector.load %arg12[%c0_21, %c0_22] : memref<1x1xf32, #tpu.memory_space<vmem>>, vector<1x1xf32>
    %c0_23 = arith.constant 0 : index
    %c0_24 = arith.constant 0 : index
    %12 = vector.load %arg13[%c0_23, %c0_24] : memref<32x32xbf16, #tpu.memory_space<vmem>>, vector<32x32xbf16>
    %c0_25 = arith.constant 0 : index
    %c0_26 = arith.constant 0 : index
    %13 = vector.load %arg14[%c0_25, %c0_26] : memref<1x32xf32, #tpu.memory_space<vmem>>, vector<1x32xf32>
    %c0_27 = arith.constant 0 : index
    %c0_28 = arith.constant 0 : index
    %14 = vector.load %arg15[%c0_27, %c0_28] : memref<32x16xbf16, #tpu.memory_space<vmem>>, vector<32x16xbf16>
    %c0_29 = arith.constant 0 : index
    %c0_30 = arith.constant 0 : index
    %15 = vector.load %arg16[%c0_29, %c0_30] : memref<1x16xf32, #tpu.memory_space<vmem>>, vector<1x16xf32>
    %c0_31 = arith.constant 0 : index
    %c0_32 = arith.constant 0 : index
    %16 = vector.load %arg17[%c0_31, %c0_32] : memref<1x16xf32, #tpu.memory_space<vmem>>, vector<1x16xf32>
    %c0_33 = arith.constant 0 : index
    %c0_34 = arith.constant 0 : index
    %17 = vector.load %arg18[%c0_33, %c0_34] : memref<1x1xf32, #tpu.memory_space<vmem>>, vector<1x1xf32>
    %18 = vector.extract_strided_slice %0 {offsets = [0, 0], sizes = [128, 1], strides = [1, 1]} : vector<128x2xf32> to vector<128x1xf32>
    %19 = vector.extract_strided_slice %0 {offsets = [0, 1], sizes = [128, 1], strides = [1, 1]} : vector<128x2xf32> to vector<128x1xf32>
    %cst = arith.constant 0.000000e+00 : f32
    %20 = vector.broadcast %cst : f32 to vector<8x1xf32>
    %21 = arith.truncf %0 : vector<128x2xf32> to vector<128x2xbf16>
    %cst_35 = arith.constant dense<0.000000e+00> : vector<128x8xf32>
    %22 = tpu.matmul %21, %3, %cst_35 {dimension_numbers = #tpu.dot_dimension_numbers<[1], [0], [0], [1], [0, 0, 1, 1], [], []>} : vector<128x2xbf16>, vector<2x8xbf16>, vector<128x8xf32> -> vector<128x8xf32>
    %23 = vector.broadcast %18 : vector<128x1xf32> to vector<128x8xf32>
    %24 = arith.mulf %23, %22 : vector<128x8xf32>
    %cst_36 = arith.constant dense<0.000000e+00> : vector<128x8xf32>
    %25 = tpu.matmul %21, %4, %cst_36 {dimension_numbers = #tpu.dot_dimension_numbers<[1], [0], [0], [1], [0, 0, 1, 1], [], []>} : vector<128x2xbf16>, vector<2x8xbf16>, vector<128x8xf32> -> vector<128x8xf32>
    %26 = vector.broadcast %19 : vector<128x1xf32> to vector<128x8xf32>
    %27 = arith.mulf %26, %25 : vector<128x8xf32>
    %28 = arith.addf %24, %27 : vector<128x8xf32>
    %29 = vector.broadcast %5 : vector<1x8xf32> to vector<128x8xf32>
    %30 = arith.addf %28, %29 : vector<128x8xf32>
    %cst_37 = arith.constant 0.000000e+00 : f32
    %31 = vector.broadcast %cst_37 : f32 to vector<128x8xf32>
    %32 = arith.maximumf %30, %31 : vector<128x8xf32>
    %33 = vector.extract_strided_slice %32 {offsets = [0, 0], sizes = [128, 4], strides = [1, 1]} : vector<128x8xf32> to vector<128x4xf32>
    %34 = vector.extract_strided_slice %32 {offsets = [0, 4], sizes = [128, 4], strides = [1, 1]} : vector<128x8xf32> to vector<128x4xf32>
    %35 = vector.shape_cast %33 : vector<128x4xf32> to vector<8x16x4xf32>
    %cst_38 = arith.constant dense<0.000000e+00> : vector<8x4xf32>
    %36 = vector.multi_reduction <add>, %35, %cst_38 [1] : vector<8x16x4xf32> to vector<8x4xf32>
    %37 = vector.broadcast %6 : vector<1x4xf32> to vector<8x4xf32>
    %38 = arith.mulf %36, %37 : vector<8x4xf32>
    %cst_39 = arith.constant dense<0.000000e+00> : vector<8xf32>
    %39 = vector.multi_reduction <add>, %38, %cst_39 [1] : vector<8x4xf32> to vector<8xf32>
    %40 = vector.shape_cast %39 : vector<8xf32> to vector<8x1xf32>
    %41 = arith.addf %20, %40 : vector<8x1xf32>
    %42 = arith.truncf %34 : vector<128x4xf32> to vector<128x4xbf16>
    %cst_40 = arith.constant dense<0.000000e+00> : vector<128x8xf32>
    %43 = tpu.matmul %42, %7, %cst_40 {dimension_numbers = #tpu.dot_dimension_numbers<[1], [0], [0], [1], [0, 0, 1, 1], [], []>} : vector<128x4xbf16>, vector<4x8xbf16>, vector<128x8xf32> -> vector<128x8xf32>
    %44 = vector.broadcast %18 : vector<128x1xf32> to vector<128x8xf32>
    %45 = arith.mulf %44, %43 : vector<128x8xf32>
    %cst_41 = arith.constant dense<0.000000e+00> : vector<128x8xf32>
    %46 = tpu.matmul %42, %8, %cst_41 {dimension_numbers = #tpu.dot_dimension_numbers<[1], [0], [0], [1], [0, 0, 1, 1], [], []>} : vector<128x4xbf16>, vector<4x8xbf16>, vector<128x8xf32> -> vector<128x8xf32>
    %47 = vector.broadcast %19 : vector<128x1xf32> to vector<128x8xf32>
    %48 = arith.mulf %47, %46 : vector<128x8xf32>
    %49 = arith.addf %45, %48 : vector<128x8xf32>
    %50 = vector.broadcast %9 : vector<1x8xf32> to vector<128x8xf32>
    %51 = arith.addf %49, %50 : vector<128x8xf32>
    %cst_42 = arith.constant 0.000000e+00 : f32
    %52 = vector.broadcast %cst_42 : f32 to vector<128x8xf32>
    %53 = arith.maximumf %51, %52 : vector<128x8xf32>
    %54 = vector.shape_cast %53 : vector<128x8xf32> to vector<8x16x8xf32>
    %cst_43 = arith.constant dense<0.000000e+00> : vector<8x8xf32>
    %55 = vector.multi_reduction <add>, %54, %cst_43 [1] : vector<8x16x8xf32> to vector<8x8xf32>
    %56 = vector.broadcast %10 : vector<1x8xf32> to vector<8x8xf32>
    %57 = arith.mulf %55, %56 : vector<8x8xf32>
    %cst_44 = arith.constant dense<0.000000e+00> : vector<8xf32>
    %58 = vector.multi_reduction <add>, %57, %cst_44 [1] : vector<8x8xf32> to vector<8xf32>
    %59 = vector.shape_cast %58 : vector<8xf32> to vector<8x1xf32>
    %60 = arith.addf %41, %59 : vector<8x1xf32>
    %61 = vector.broadcast %11 : vector<1x1xf32> to vector<8x1xf32>
    %62 = arith.addf %60, %61 : vector<8x1xf32>
    %63 = arith.truncf %1 : vector<8x32xf32> to vector<8x32xbf16>
    %cst_45 = arith.constant dense<0.000000e+00> : vector<8x32xf32>
    %64 = tpu.matmul %63, %12, %cst_45 {dimension_numbers = #tpu.dot_dimension_numbers<[1], [0], [0], [1], [0, 0, 1, 1], [], []>} : vector<8x32xbf16>, vector<32x32xbf16>, vector<8x32xf32> -> vector<8x32xf32>
    %65 = vector.broadcast %13 : vector<1x32xf32> to vector<8x32xf32>
    %66 = arith.addf %64, %65 : vector<8x32xf32>
    %cst_46 = arith.constant 0.000000e+00 : f32
    %67 = vector.broadcast %cst_46 : f32 to vector<8x32xf32>
    %68 = arith.maximumf %66, %67 : vector<8x32xf32>
    %69 = arith.truncf %68 : vector<8x32xf32> to vector<8x32xbf16>
    %cst_47 = arith.constant dense<0.000000e+00> : vector<8x16xf32>
    %70 = tpu.matmul %69, %14, %cst_47 {dimension_numbers = #tpu.dot_dimension_numbers<[1], [0], [0], [1], [0, 0, 1, 1], [], []>} : vector<8x32xbf16>, vector<32x16xbf16>, vector<8x16xf32> -> vector<8x16xf32>
    %71 = vector.broadcast %15 : vector<1x16xf32> to vector<8x16xf32>
    %72 = arith.addf %70, %71 : vector<8x16xf32>
    %cst_48 = arith.constant 0.000000e+00 : f32
    %73 = vector.broadcast %cst_48 : f32 to vector<8x16xf32>
    %74 = arith.maximumf %72, %73 : vector<8x16xf32>
    %75 = vector.broadcast %16 : vector<1x16xf32> to vector<8x16xf32>
    %76 = arith.mulf %74, %75 : vector<8x16xf32>
    %cst_49 = arith.constant dense<0.000000e+00> : vector<8xf32>
    %77 = vector.multi_reduction <add>, %76, %cst_49 [1] : vector<8x16xf32> to vector<8xf32>
    %78 = vector.shape_cast %77 : vector<8xf32> to vector<8x1xf32>
    %79 = vector.broadcast %17 : vector<1x1xf32> to vector<8x1xf32>
    %80 = arith.addf %78, %79 : vector<8x1xf32>
    %81 = arith.addf %2, %62 : vector<8x1xf32>
    %82 = arith.addf %81, %80 : vector<8x1xf32>
    %c0_50 = arith.constant 0 : index
    %c0_51 = arith.constant 0 : index
    %83 = vector.load %arg19[%c0_50, %c0_51] : memref<8x1xf32, #tpu.memory_space<vmem>>, vector<8x1xf32>
    tpu.vector_store %arg19[%c0_50, %c0_51], %82 {strides = array<i32>} : memref<8x1xf32, #tpu.memory_space<vmem>>, vector<8x1xf32>,
    return
  }
  func.func @transform_0(%arg0: i32) -> (i32, i32) {
    %c0_i32 = arith.constant 0 : i32
    %c0_i32_0 = arith.constant 0 : i32
    return %arg0, %c0_i32 : i32, i32
  }
  func.func @transform_1(%arg0: i32) -> (i32, i32) {
    %c0_i32 = arith.constant 0 : i32
    %c0_i32_0 = arith.constant 0 : i32
    return %arg0, %c0_i32 : i32, i32
  }
  func.func @transform_2(%arg0: i32) -> (i32, i32) {
    %c0_i32 = arith.constant 0 : i32
    %c0_i32_0 = arith.constant 0 : i32
    return %arg0, %c0_i32 : i32, i32
  }
  func.func @transform_3(%arg0: i32) -> (i32, i32) {
    %c0_i32 = arith.constant 0 : i32
    %c0_i32_0 = arith.constant 0 : i32
    %c0_i32_1 = arith.constant 0 : i32
    return %c0_i32, %c0_i32_0 : i32, i32
  }
  func.func @transform_4(%arg0: i32) -> (i32, i32) {
    %c0_i32 = arith.constant 0 : i32
    %c0_i32_0 = arith.constant 0 : i32
    %c0_i32_1 = arith.constant 0 : i32
    return %c0_i32, %c0_i32_0 : i32, i32
  }
  func.func @transform_5(%arg0: i32) -> (i32, i32) {
    %c0_i32 = arith.constant 0 : i32
    %c0_i32_0 = arith.constant 0 : i32
    %c0_i32_1 = arith.constant 0 : i32
    return %c0_i32, %c0_i32_0 : i32, i32
  }
  func.func @transform_6(%arg0: i32) -> (i32, i32) {
    %c0_i32 = arith.constant 0 : i32
    %c0_i32_0 = arith.constant 0 : i32
    %c0_i32_1 = arith.constant 0 : i32
    return %c0_i32, %c0_i32_0 : i32, i32
  }
  func.func @transform_7(%arg0: i32) -> (i32, i32) {
    %c0_i32 = arith.constant 0 : i32
    %c0_i32_0 = arith.constant 0 : i32
    %c0_i32_1 = arith.constant 0 : i32
    return %c0_i32, %c0_i32_0 : i32, i32
  }
  func.func @transform_8(%arg0: i32) -> (i32, i32) {
    %c0_i32 = arith.constant 0 : i32
    %c0_i32_0 = arith.constant 0 : i32
    %c0_i32_1 = arith.constant 0 : i32
    return %c0_i32, %c0_i32_0 : i32, i32
  }
  func.func @transform_9(%arg0: i32) -> (i32, i32) {
    %c0_i32 = arith.constant 0 : i32
    %c0_i32_0 = arith.constant 0 : i32
    %c0_i32_1 = arith.constant 0 : i32
    return %c0_i32, %c0_i32_0 : i32, i32
  }
  func.func @transform_10(%arg0: i32) -> (i32, i32) {
    %c0_i32 = arith.constant 0 : i32
    %c0_i32_0 = arith.constant 0 : i32
    %c0_i32_1 = arith.constant 0 : i32
    return %c0_i32, %c0_i32_0 : i32, i32
  }
  func.func @transform_11(%arg0: i32) -> (i32, i32) {
    %c0_i32 = arith.constant 0 : i32
    %c0_i32_0 = arith.constant 0 : i32
    %c0_i32_1 = arith.constant 0 : i32
    return %c0_i32, %c0_i32_0 : i32, i32
  }
  func.func @transform_12(%arg0: i32) -> (i32, i32) {
    %c0_i32 = arith.constant 0 : i32
    %c0_i32_0 = arith.constant 0 : i32
    %c0_i32_1 = arith.constant 0 : i32
    return %c0_i32, %c0_i32_0 : i32, i32
  }
  func.func @transform_13(%arg0: i32) -> (i32, i32) {
    %c0_i32 = arith.constant 0 : i32
    %c0_i32_0 = arith.constant 0 : i32
    %c0_i32_1 = arith.constant 0 : i32
    return %c0_i32, %c0_i32_0 : i32, i32
  }
  func.func @transform_14(%arg0: i32) -> (i32, i32) {
    %c0_i32 = arith.constant 0 : i32
    %c0_i32_0 = arith.constant 0 : i32
    %c0_i32_1 = arith.constant 0 : i32
    return %c0_i32, %c0_i32_0 : i32, i32
  }
  func.func @transform_15(%arg0: i32) -> (i32, i32) {
    %c0_i32 = arith.constant 0 : i32
    %c0_i32_0 = arith.constant 0 : i32
    %c0_i32_1 = arith.constant 0 : i32
    return %c0_i32, %c0_i32_0 : i32, i32
  }
  func.func @transform_16(%arg0: i32) -> (i32, i32) {
    %c0_i32 = arith.constant 0 : i32
    %c0_i32_0 = arith.constant 0 : i32
    %c0_i32_1 = arith.constant 0 : i32
    return %c0_i32, %c0_i32_0 : i32, i32
  }
  func.func @transform_17(%arg0: i32) -> (i32, i32) {
    %c0_i32 = arith.constant 0 : i32
    %c0_i32_0 = arith.constant 0 : i32
    %c0_i32_1 = arith.constant 0 : i32
    return %c0_i32, %c0_i32_0 : i32, i32
  }
  func.func @transform_18(%arg0: i32) -> (i32, i32) {
    %c0_i32 = arith.constant 0 : i32
    %c0_i32_0 = arith.constant 0 : i32
    return %arg0, %c0_i32 : i32, i32
  }
}

</mosaic_0001>

<bundles_post_ra>
// kernel: tpu_custom_call.1
= control target key start
LH: loop header
LB: loop body
LE: loop exit
PB: predicated region body
PF: predicated region fallthrough
CT: control target
= control target key end

     0   :  { %s2304_s0 = inlined_call_operand.vmem [shape: f32[256,2], index: 0, kind: input, shape index: {}]   ;;  %s2305_s1 = inlined_call_operand.vmem [shape: f32[16,32], index: 1, kind: input, shape index: {}]   ;;  %s2306_s2 = inlined_call_operand.vmem [shape: f32[16,1], index: 2, kind: input, shape index: {}]   ;;  %s2307_s3 = inlined_call_operand.vmem [shape: bf16[2,8], index: 3, kind: input, shape index: {}]   ;;  %s2308_s4 = inlined_call_operand.vmem [shape: bf16[2,8], index: 4, kind: input, shape index: {}]   ;;  %s2309_s5 = inlined_call_operand.vmem [shape: f32[1,8], index: 5, kind: input, shape index: {}]   ;;  %s2310_s6 = inlined_call_operand.vmem [shape: f32[1,4], index: 6, kind: input, shape index: {}]   ;;  %s2311_s7 = inlined_call_operand.vmem [shape: bf16[4,8], index: 7, kind: input, shape index: {}]   ;;  %s2312_s8 = inlined_call_operand.vmem [shape: bf16[4,8], index: 8, kind: input, shape index: {}]   ;;  %s2313_s9 = inlined_call_operand.vmem [shape: f32[1,8], index: 9, kind: input, shape index: {}]   ;;  %s2314_s10 = inlined_call_operand.vmem [shape: f32[1,8], index: 10, kind: input, shape index: {}]   ;;  %s2315_s11 = inlined_call_operand.<no memory space> [shape: f32[1,1], index: 11, kind: input, shape index: {}]   ;;  %s2316_s12 = inlined_call_operand.vmem [shape: bf16[32,32], index: 12, kind: input, shape index: {}]   ;;  %s2317_s13 = inlined_call_operand.vmem [shape: f32[1,32], index: 13, kind: input, shape index: {}]   ;;  %s2318_s14 = inlined_call_operand.vmem [shape: bf16[32,16], index: 14, kind: input, shape index: {}]   ;;  %s2319_s15 = inlined_call_operand.vmem [shape: f32[1,16], index: 15, kind: input, shape index: {}]   ;;  %s2320_s16 = inlined_call_operand.vmem [shape: f32[1,16], index: 16, kind: input, shape index: {}]   ;;  %s2321_s18 = inlined_call_operand.vmem [shape: f32[16,1], index: 18, kind: output, shape index: {}]   ;;  %s2322_s17 = inlined_call_operand.<no memory space> [shape: f32[1,1], index: 17, kind: input, shape index: {}]  }
   0x1   :  { %2323 = sst [smem:[#allocation4_spill]] %s2304_s0  ;;  %v23_v0 = vstv %s2315_s11  ;;  %v25_v1 = vstv %s2322_s17  ;;  %s1875_s0 = smov 0  }
   0x2   :  { %2324 = sst [smem:[#allocation5_spill]] %s2305_s1  ;;  %24 = vst [vmem:[#allocation2] sm:$0x1] %v23_v0 }
   0x3   :  { %2325 = sst [smem:[#allocation6_spill]] %s2306_s2  ;;  %26 = vst [vmem:[#allocation3] sm:$0x1] %v25_v1 }
   0x4 LB: > { %s1881_s19 = sadd.s32 4294967295, %s1769_s0   ;;  %p1660_p0 = scmp.ge.s32.totalorder %s1769_s0, 1  ;;  %s1769_s0 = sphi %s1875_s0, %s32_s0  }
   0x5   : > { %p535_p1 = scmp.lt.s32.totalorder %s1769_s0, 3 }
   0x7   : > { %p536_p2 = pnand %p1660_p0, %p535_p1 }
   0x8   : > { %s1661_s21 = sshll.u32 (!%p536_p2), %s1881_s19, 4  ;;  %s2326_s24 = sld [smem:[#allocation4_spill]] (!%p536_p2) }
   0x9   : > { %539 = sbr.rel (%p536_p2) target bundleno = 754 (0x2f2), region = 92  ;;  %p597_p3 = scmp.lt.s32.totalorder (!%p536_p2), %s1661_s21, 31 }
   0xa   : > { %s1773_s28 = smov (!%p536_p2), 124   ;;  %p602_p4 = scmp.lt.s32.totalorder (!%p536_p2), %s1881_s19, 1 }
   0xb   : > { %s2327_s27 = sld [smem:[#allocation5_spill]] (!%p536_p2) }
   0xc   : > { %s2328_s30 = sld [smem:[#allocation6_spill]] (!%p536_p2) }
   0xe   : > { %v633_v2 = vld [vmem:[%s2307_s3] sm:$0x1]  ;;  %vm687_vm0 = vcmask 1040384   ;;  %s2330_s21 = smov (!%p597_p3, %s1661_s21), 31  ;;  %v1771_v6 = vmov 1   ;;  %v1772_v7 = vmov 0  }
   0xf   : > { %v634_v3 = vld [vmem:[%s2308_s4] sm:$0x1]  ;;  %v689_v4 = vsel %vm687_vm0, %v633_v2, 0  ;;  %1734 = vset.pattern.permute.xlu1 %v1771_v6  ;;  %1733 = vset.pattern.permute.xlu0 %v1772_v7  ;;  %s1662_s22 = sshll.u32 %s2330_s21, 3  ;;  %vm662_vm1 = vcmask 15360   ;;  %vm1019_vm2 = vcmask 31744  }
  0x10   : > { %v837_v5 = vsel %vm687_vm0, %v634_v3, 0  ;;  %698 = vmatpush.bf16.msra.mxu0 %v689_v4  ;;  %1735 = vset.pattern.permute.xlu2 %v1772_v7  ;;  %s1898_s25 = scalar_lea.vmem %s2326_s24, %s1662_s22  ;;  %v1965_v37 = vld [vmem:[%s2309_s5] ss:$0 sm:$0xff]  ;;  %vm1193_vm3 = vcmask 1041408   ;;  %vm1112_vm4 = vcmask 1041409   ;;  %vm1115_vm5 = vcmask 1042434  }
  0x11   : > { %846 = vmatpush.bf16.msra.mxu1 %v837_v5  ;;  %v615_v8 = vld [vmem:[%s1898_s25] sm:$0xff]  ;;  %v616_v9 = vld [vmem:[%s1898_s25 + $0x8] sm:$0xff]  ;;  %v617_v11 = vld [vmem:[%s1898_s25 + $0x10] sm:$0xff]  ;;  %vm1118_vm6 = vcmask 1043459   ;;  %vm1121_vm7 = vcmask 1044484   ;;  %s2332_s19 = smov (!%p602_p4, %s1881_s19), 1 }
  0x12   : > { %v654_v10 = vpack.c.bf16 %v616_v9, %v615_v8  ;;  %889 = vperm.xlu1 %1734, %v615_v8   ;;  %742 = vperm.xlu0 %1733, %v615_v8   ;;  %v618_v12 = vld [vmem:[%s1898_s25 + $0x18] sm:$0xff]  ;;  %v619_v14 = vld [vmem:[%s1898_s25 + $0x20] sm:$0xff]  ;;  %v620_v15 = vld [vmem:[%s1898_s25 + $0x28] sm:$0xff]  ;;  %s2125_s24 = sshll.u32 %s2332_s19, 3  ;;  %vm1512_vm8 = vcmask 261120   ;;  %vm1124_vm9 = vcmask 1045509  }
  0x13   : > { %752 = vperm.xlu2 %1735, %v617_v11   ;;  %v655_v13 = vpack.c.bf16 %v618_v12, %v617_v11  ;;  %v656_v16 = vpack.c.bf16 %v620_v15, %v619_v14  ;;  %v621_v17 = vld [vmem:[%s1898_s25 + $0x30] sm:$0xff]  ;;  %v622_v18 = vld [vmem:[%s1898_s25 + $0x38] sm:$0xff]  ;;  %v1920_v19 = vld [vmem:[%s1898_s25 + $0x40] sm:$0xff]  ;;  %s605_s29 = scalar_lea.vmem %s2327_s27, %s2125_s24  ;;  %vm1127_vm10 = vcmask 1046534   ;;  %vm1130_vm11 = vcmask 1047559   ;;  %s613_s1 = scalar_lea.vmem %s2321_s18, %s2125_s24 }
  0x14   : > { %1666 = vmatmul.msk.bf16.vlgmr.msra.gmra.mxu0 %vm662_vm1, %v654_v10  ;;  %1674 = vmatmul.msk.bf16.vlgmr.msra.gmra.mxu1 %vm662_vm1, %v654_v10  ;;  %v657_v20 = vpack.c.bf16 %v622_v18, %v621_v17  ;;  %v624_v21 = vld [vmem:[%s1898_s25 + $0x48] sm:$0xff]  ;;  %v1935_v23 = vld [vmem:[%s1898_s25 + $0x50] sm:$0xff]  ;;  %v626_v24 = vld [vmem:[%s1898_s25 + $0x58] sm:$0xff]  ;;  %vm1381_vm12 = vcmask 64512   ;;  %vm1567_vm13 = vcmask 130048   ;;  %vm1577_vm14 = vcmask 7168  }
  0x15   : > { %v658_v22 = vpack.c.bf16 %v624_v21, %v1920_v19  ;;  %v659_v25 = vpack.c.bf16 %v626_v24, %v1935_v23  ;;  %v1948_v28 = vld [vmem:[%s1898_s25 + $0x60] sm:$0xff]  ;;  %v1951_v29 = vld [vmem:[%s1898_s25 + $0x68] sm:$0xff]  ;;  %v1979_v49 = vld [vmem:[%s1898_s25 + $0x70] sm:$0xff] }
  0x16   : > { %v660_v30 = vpack.c.bf16 %v1951_v29, %v1948_v28  ;;  %v1982_v50 = vld [vmem:[%s1898_s25 + $0x78] sm:$0xff] }
  0x17   : > { %v661_v52 = vpack.c.bf16 %v1982_v50, %v1979_v49 }
  0x1a   : > { %893 = vperm.xlu1 %1734, %v616_v9   ;;  %747 = vperm.xlu0 %1733, %v616_v9  }
  0x1b   : > { %757 = vperm.xlu2 %1735, %v618_v12  }
  0x22   : > { %901 = vperm.xlu1 %1734, %v618_v12   ;;  %1736 = vset.pattern.permute.xlu0 %v1771_v6 }
  0x23   : > { %897 = vperm.xlu0 %1736, %v617_v11   ;;  %762 = vperm.xlu2 %1735, %v619_v14  }
  0x24   : > { %1667 = vmatmul.msk.bf16.gmra.mxu0 %vm662_vm1, %v655_v13  ;;  %1675 = vmatmul.msk.bf16.gmra.mxu1 %vm662_vm1, %v655_v13 }
  0x2a   : > { %1737 = vset.pattern.permute.xlu1 %v1772_v7 }
  0x2b   : > { %909 = vperm.xlu0 %1736, %v620_v15   ;;  %767 = vperm.xlu1 %1737, %v620_v15  }
  0x2c   : > { %1738 = vset.pattern.permute.xlu2 %v1771_v6 }
  0x2d   : > { %905 = vperm.xlu2 %1738, %v619_v14  }
  0x33   : > { %913 = vperm.xlu0 %1736, %v621_v17   ;;  %772 = vperm.xlu1 %1737, %v621_v17  }
  0x34   : > { %1668 = vmatmul.msk.bf16.gmra.mxu0 %vm662_vm1, %v656_v16  ;;  %1676 = vmatmul.msk.bf16.gmra.mxu1 %vm662_vm1, %v656_v16 }
  0x35   : > { %1739 = vset.pattern.permute.xlu2 %v1772_v7 }
  0x36   : > { %777 = vperm.xlu2 %1739, %v622_v18  }
  0x3b   : > { %1740 = vset.pattern.permute.xlu1 %v1771_v6  ;;  %1741 = vset.pattern.permute.xlu0 %v1772_v7 }
  0x3c   : > { %917 = vperm.xlu1 %1740, %v622_v18   ;;  %782 = vperm.xlu0 %1741, %v1920_v19  }
  0x3e   : > { %1743 = vset.pattern.permute.xlu2 %v1771_v6 }
  0x44   : > { %1669 = vmatmul.msk.bf16.gmra.mxu0 %vm662_vm1, %v657_v20  ;;  %1677 = vmatmul.msk.bf16.gmra.mxu1 %vm662_vm1, %v657_v20 }
  0x45   : > { %1742 = vset.pattern.permute.xlu1 %v1772_v7  ;;  %792 = vperm.xlu0 %1741, %v1935_v23  }
  0x46   : > { %787 = vperm.xlu1 %1742, %v624_v21  }
  0x4d   : > { %1746 = vset.pattern.permute.xlu0 %v1771_v6 }
  0x4e   : > { %1744 = vset.pattern.permute.xlu1 %v1771_v6  ;;  %933 = vperm.xlu0 %1746, %v626_v24  }
  0x4f   : > { %925 = vperm.xlu1 %1744, %v624_v21  }
  0x54   : > { %1670 = vmatmul.msk.bf16.gmra.mxu0 %vm662_vm1, %v658_v22  ;;  %1678 = vmatmul.msk.bf16.gmra.mxu1 %vm662_vm1, %v658_v22 }
  0x56   : > { %941 = vperm.xlu0 %1746, %v1951_v29  }
  0x57   : > { %1745 = vset.pattern.permute.xlu1 %v1772_v7 }
  0x58   : > { %797 = vperm.xlu1 %1745, %v626_v24  }
  0x5e   : > { %1750 = vset.pattern.permute.xlu0 %v1772_v7 }
  0x5f   : > { %817 = vperm.xlu0 %1750, %v1982_v50  }
  0x64   : > { %1671 = vmatmul.msk.bf16.gmra.mxu0 %vm662_vm1, %v659_v25  ;;  %1679 = vmatmul.msk.bf16.gmra.mxu1 %vm662_vm1, %v659_v25 }
  0x67   : > { %1753 = vset.pattern.permute.xlu0 %v1771_v6 }
  0x6d   : > { %v1960_v35 = vpop.permute.xlu2 %752 }
  0x74   : > { %1672 = vmatmul.msk.bf16.gmra.mxu0 %vm662_vm1, %v660_v30  ;;  %1680 = vmatmul.msk.bf16.gmra.mxu1 %vm662_vm1, %v660_v30 }
  0x75   : > { %v1975_v47 = vpop.permute.xlu2 %757 }
  0x7d   : > { %v1996_v63 = vpop.permute.xlu2 %762 }
  0x84   : > { %v1943_v26 = vpop.permute.xlu0 %742  ;;  %v1945_v27 = vpop.permute.xlu1 %889  ;;  %1673 = vmatmul.msk.bf16.gmra.mxu0 %vm662_vm1, %v661_v52  ;;  %1681 = vmatmul.msk.bf16.gmra.mxu1 %vm662_vm1, %v661_v52 }
  0x87   : > { %v2006_v13 = vpop.permute.xlu2 %905 }
  0x8c   : > { %v1967_v38 = vpop.permute.xlu0 %747  ;;  %v1970_v39 = vpop.permute.xlu1 %893 }
  0x91   : > { %v700_v31 = vpop.f32.mrf.mxu0  ;;  %v848_v32 = vpop.f32.mrf.mxu1 }
  0x92   : > { %v820_v33 = vmul.f32 %v1943_v26, %v700_v31  ;;  %v952_v34 = vmul.f32 %v1945_v27, %v848_v32 }
  0x94   : > { %v968_v36 = vadd.f32 %v952_v34, %v820_v33  ;;  %v1999_v0 = vpop.permute.xlu1 %901 }
  0x95   : > { %v1984_v51 = vpop.permute.xlu0 %897 }
  0x96   : > { %v987_v40 = vadd.f32 %v1965_v37, %v968_v36 }
  0x98   : > { %v1003_v46 = vmax.f32 %v987_v40, 0.0 }
  0x99   : > { %v702_v41 = vpop.f32.mrf.mxu0  ;;  %v850_v42 = vpop.f32.mrf.mxu1 }
  0x9a   : > { %v821_v43 = vmul.f32 %v1967_v38, %v702_v41  ;;  %v953_v44 = vmul.f32 %v1970_v39, %v850_v42  ;;  %v1020_v54 = vsel %vm1019_vm2, %v1003_v46, 0.0 }
  0x9c   : > { %v969_v45 = vadd.f32 %v953_v44, %v821_v43 }
  0x9d   : > { %v2013_v30 = vpop.permute.xlu1 %767  ;;  %v2015_v32 = vpop.permute.xlu0 %909 }
  0x9e   : > { %v988_v48 = vadd.f32 %v1965_v37, %v969_v45 }
  0xa0   : > { %v1004_v53 = vmax.f32 %v988_v48, 0.0 }
  0xa1   : > { %v705_v55 = vpop.f32.mrf.mxu0  ;;  %v853_v56 = vpop.f32.mrf.mxu1 }
  0xa2   : > { %v1021_v57 = vsel %vm1019_vm2, %v1004_v53, 0.0  ;;  %v822_v58 = vmul.f32 %v1960_v35, %v705_v55  ;;  %v954_v59 = vmul.f32 %v1984_v51, %v853_v56  ;;  %v1137_v60 = vpack.c.bf16 %v1004_v53, %v1003_v46  ;;  %v2025_v56 = vld [vmem:[%s2310_s6] ss:$0 sm:$0xff] }
  0xa3   : > { %v1022_v61 = vadd.f32 %v1021_v57, %v1020_v54 }
  0xa4   : > { %1153 = vrot.lane.b32.xlu2 %v1137_v60, %s1773_s28  ;;  %v970_v62 = vadd.f32 %v954_v59, %v822_v58 }
  0xa5   : > { %v1023_v8 = vrot.slane %v1022_v61, 4  ;;  %v2027_v58 = vpop.permute.xlu1 %772  ;;  %v2029_v59 = vpop.permute.xlu0 %913 }
  0xa6   : > { %v989_v1 = vadd.f32 %v1965_v37, %v970_v62 }
  0xa7   : > { %v1024_v12 = vadd.f32 %v1023_v8, %v1022_v61  ;;  %v637_v61 = vld [vmem:[%s2311_s7] sm:$0x3] }
  0xa8   : > { %v1005_v10 = vmax.f32 %v989_v1, 0.0 }
  0xa9   : > { %v707_v2 = vpop.f32.mrf.mxu0  ;;  %v855_v3 = vpop.f32.mrf.mxu1  ;;  %v1025_v24 = vrot.slane %v1024_v12, 2 }
  0xaa   : > { %v823_v4 = vmul.f32 %v1975_v47, %v707_v2  ;;  %v955_v5 = vmul.f32 %v1999_v0, %v855_v3  ;;  %v1029_v15 = vsel %vm1019_vm2, %v1005_v10, 0.0 }
  0xab   : > { %v1026_v33 = vadd.f32 %v1025_v24, %v1024_v12 }
  0xac   : > { %v971_v9 = vadd.f32 %v955_v5, %v823_v4  ;;  %921 = vperm.xlu2 %1743, %v1920_v19   ;;  %v1195_v4 = vsel %vm1193_vm3, %v637_v61, 0  ;;  %v638_v5 = vld [vmem:[%s2312_s8] sm:$0x3] }
  0xad   : > { %v1027_v45 = vrot.slane %v1026_v33, 1  ;;  %1204 = vmatpush.bf16.msra.mxu2 %v1195_v4 }
  0xae   : > { %v990_v11 = vadd.f32 %v1965_v37, %v971_v9  ;;  %v2054_v24 = vpop.permute.xlu1 %917 }
  0xaf   : > { %v1028_v55 = vadd.f32 %v1027_v45, %v1026_v33 }
  0xb0   : > { %v1006_v14 = vmax.f32 %v990_v11, 0.0 }
  0xb1   : > { %v710_v16 = vpop.f32.mrf.mxu0  ;;  %v858_v17 = vpop.f32.mrf.mxu1  ;;  %v1095_v12 = vmul.f32 %v2025_v56, %v1028_v55 }
  0xb2   : > { %v1030_v18 = vsel %vm1019_vm2, %v1006_v14, 0.0  ;;  %v824_v20 = vmul.f32 %v1996_v63, %v710_v16  ;;  %v956_v21 = vmul.f32 %v2006_v13, %v858_v17  ;;  %v1138_v22 = vpack.c.bf16 %v1006_v14, %v1005_v10 }
  0xb3   : > { %v1031_v19 = vadd.f32 %v1030_v18, %v1029_v15  ;;  %v1263_v16 = vsel %vm1193_vm3, %v638_v5, 0 }
  0xb4   : > { %1155 = vrot.lane.b32.xlu2 %v1138_v22, %s1773_s28  ;;  %v972_v31 = vadd.f32 %v956_v21, %v824_v20  ;;  %1272 = vmatpush.bf16.msra.mxu3 %v1263_v16  ;;  %v2052_v22 = vpop.permute.xlu2 %777 }
  0xb5   : > { %v1032_v25 = vrot.slane %v1031_v19, 4 }
  0xb6   : > { %v991_v40 = vadd.f32 %v1965_v37, %v972_v31 }
  0xb7   : > { %v1033_v34 = vadd.f32 %v1032_v25, %v1031_v19 }
  0xb8   : > { %v1007_v53 = vmax.f32 %v991_v40, 0.0  ;;  %v2076_v5 = vpop.permute.xlu1 %787 }
  0xb9   : > { %v1034_v36 = vrot.slane %v1033_v34, 2  ;;  %v712_v41 = vpop.f32.mrf.mxu0  ;;  %v860_v42 = vpop.f32.mrf.mxu1 }
  0xba   : > { %v825_v43 = vmul.f32 %v2013_v30, %v712_v41  ;;  %v957_v44 = vmul.f32 %v2015_v32, %v860_v42  ;;  %v1038_v1 = vsel %vm1019_vm2, %v1007_v53, 0.0 }
  0xbb   : > { %v1035_v46 = vadd.f32 %v1034_v36, %v1033_v34 }
  0xbc   : > { %v973_v48 = vadd.f32 %v957_v44, %v825_v43  ;;  %929 = vperm.xlu2 %1743, %v1935_v23   ;;  %v1719_v23 = vld [vmem:[%s2316_s12 + $0x8] sm:$0xff] }
  0xbd   : > { %v1036_v52 = vrot.slane %v1035_v46, 1  ;;  %1522 = vmatpush.bf16.msrb.mxu0 %v1719_v23 }
  0xbe   : > { %v992_v54 = vadd.f32 %v1965_v37, %v973_v48 }
  0xbf   : > { %v1037_v57 = vadd.f32 %v1036_v52, %v1035_v46 }
  0xc0   : > { %v1008_v60 = vmax.f32 %v992_v54, 0.0 }
  0xc1   : > { %v1096_v62 = vmul.f32 %v2025_v56, %v1037_v57  ;;  %v715_v2 = vpop.f32.mrf.mxu0  ;;  %v863_v3 = vpop.f32.mrf.mxu1 }
  0xc2   : > { %v1039_v8 = vsel %vm1019_vm2, %v1008_v60, 0.0  ;;  %v826_v9 = vmul.f32 %v2027_v58, %v715_v2  ;;  %v958_v10 = vmul.f32 %v2029_v59, %v863_v3  ;;  %v1139_v11 = vpack.c.bf16 %v1008_v60, %v1007_v53 }
  0xc3   : > { %v1111_v14 = vrot.slane %v1096_v62, 7  ;;  %v1040_v15 = vadd.f32 %v1039_v8, %v1038_v1 }
  0xc4   : > { %1157 = vrot.lane.b32.xlu1 %v1139_v11, %s1773_s28  ;;  %1747 = vset.pattern.permute.xlu2 %v1772_v7  ;;  %v974_v20 = vadd.f32 %v958_v10, %v826_v9  ;;  %v2078_v9 = vpop.permute.xlu0 %782 }
  0xc5   : > { %v1041_v17 = vrot.slane %v1040_v15, 4  ;;  %802 = vperm.xlu2 %1747, %v1948_v28   ;;  %v1113_v18 = vsel %vm1112_vm4, %v1111_v14, %v1095_v12 }
  0xc6   : > { %v993_v33 = vadd.f32 %v1965_v37, %v974_v20 }
  0xc7   : > { %v1042_v21 = vadd.f32 %v1041_v17, %v1040_v15 }
  0xc8   : > { %v1009_v43 = vmax.f32 %v993_v33, 0.0 }
  0xc9   : > { %v1043_v19 = vrot.slane %v1042_v21, 2  ;;  %v717_v25 = vpop.f32.mrf.mxu0  ;;  %v865_v31 = vpop.f32.mrf.mxu1 }
  0xca   : > { %v827_v34 = vmul.f32 %v2052_v22, %v717_v25  ;;  %v959_v36 = vmul.f32 %v2054_v24, %v865_v31  ;;  %v1047_v52 = vsel %vm1019_vm2, %v1009_v43, 0.0  ;;  %v1718_v25 = vld [vmem:[%s2316_s12] sm:$0xff] }
  0xcb   : > { %v1044_v40 = vadd.f32 %v1043_v19, %v1042_v21  ;;  %1523 = vmatpush.bf16.msrb.mxu0 %v1718_v25 }
  0xcc   : > { %v975_v41 = vadd.f32 %v959_v36, %v827_v34  ;;  %807 = vperm.xlu1 %1745, %v1951_v29   ;;  %v2086_v15 = vpop.permute.xlu0 %792 }
  0xcd   : > { %v1045_v42 = vrot.slane %v1044_v40, 1  ;;  %1748 = vset.pattern.permute.xlu2 %v1771_v6 }
  0xce   : > { %v994_v44 = vadd.f32 %v1965_v37, %v975_v41  ;;  %937 = vperm.xlu2 %1748, %v1948_v28  }
  0xcf   : > { %v1046_v45 = vadd.f32 %v1045_v42, %v1044_v40 }
  0xd0   : > { %v1010_v46 = vmax.f32 %v994_v44, 0.0 }
  0xd1   : > { %v1097_v48 = vmul.f32 %v2025_v56, %v1046_v45  ;;  %v720_v8 = vpop.f32.mrf.mxu0 }
  0xd2   : > { %v1048_v53 = vsel %vm1019_vm2, %v1010_v46, 0.0  ;;  %v1140_v54 = vpack.c.bf16 %v1010_v46, %v1009_v43 }
  0xd3   : > { %v1114_v55 = vrot.slane %v1097_v48, 6  ;;  %v1049_v29 = vadd.f32 %v1048_v53, %v1047_v52 }
  0xd4   : > { %1159 = vrot.lane.b32.xlu1 %v1140_v54, %s1773_s28  ;;  %v2100_v42 = vpop.permute.xlu0 %933 }
  0xd5   : > { %v1050_v57 = vrot.slane %v1049_v29, 4  ;;  %1751 = vset.pattern.permute.xlu1 %v1771_v6  ;;  %v1116_v60 = vsel %vm1115_vm5, %v1114_v55, %v1113_v18  ;;  %v828_v18 = vmul.f32 %v2078_v9, %v720_v8 }
  0xd6   : > { %1749 = vset.pattern.permute.xlu2 %v1772_v7  ;;  %v868_v7 = vpop.f32.mrf.mxu1 }
  0xd7   : > { %v1051_v28 = vadd.f32 %v1050_v57, %v1049_v29  ;;  %812 = vperm.xlu2 %1749, %v1979_v49  }
  0xd9   : > { %v1052_v23 = vrot.slane %v1051_v28, 2  ;;  %v722_v11 = vpop.f32.mrf.mxu0 }
  0xdb   : > { %v1053_v61 = vadd.f32 %v1052_v23, %v1051_v28 }
  0xdc   : > { %945 = vperm.xlu1 %1751, %v1979_v49   ;;  %v2080_v49 = vpop.permute.xlu1 %925 }
  0xdd   : > { %v1054_v62 = vrot.slane %v1053_v61, 1 }
  0xde   : > { %v870_v10 = vpop.f32.mrf.mxu1 }
  0xdf   : > { %v1055_v1 = vadd.f32 %v1054_v62, %v1053_v61  ;;  %1752 = vset.pattern.permute.xlu2 %v1771_v6  ;;  %v961_v6 = vmul.f32 %v2080_v49, %v870_v10 }
  0xe0   : > { %949 = vperm.xlu2 %1752, %v1982_v50   ;;  %v829_v50 = vmul.f32 %v2076_v5, %v722_v11 }
  0xe1   : > { %v1098_v2 = vmul.f32 %v2025_v56, %v1055_v1  ;;  %v725_v17 = vpop.f32.mrf.mxu0 }
  0xe2   : > { %v977_v14 = vadd.f32 %v961_v6, %v829_v50  ;;  %v830_v57 = vmul.f32 %v2086_v15, %v725_v17 }
  0xe3   : > { %v1117_v3 = vrot.slane %v1098_v2, 5 }
  0xe4   : > { %v996_v20 = vadd.f32 %v1965_v37, %v977_v14  ;;  %v2097_v36 = vpop.permute.xlu1 %797 }
  0xe5   : > { %v1119_v4 = vsel %vm1118_vm6, %v1117_v3, %v1116_v60 }
  0xe6   : > { %v873_v16 = vpop.f32.mrf.mxu1  ;;  %v1012_v33 = vmax.f32 %v996_v20, 0.0 }
  0xe8   : > { %v1057_v40 = vsel %vm1019_vm2, %v1012_v33, 0.0 }
  0xe9   : > { %v727_v45 = vpop.f32.mrf.mxu0 }
  0xea   : > { %v831_v54 = vmul.f32 %v2097_v36, %v727_v45  ;;  %v631_v45 = vld [vmem:[%s605_s29] sm:$0xff] }
  0xee   : > { %v875_v43 = vpop.f32.mrf.mxu1 }
  0xef   : > { %v963_v53 = vmul.f32 %v2100_v42, %v875_v43 }
  0xf1   : > { %v979_v60 = vadd.f32 %v963_v53, %v831_v54 }
  0xf3   : > { %v998_v2 = vadd.f32 %v1965_v37, %v979_v60 }
  0xf5   : > { %v1014_v10 = vmax.f32 %v998_v2, 0.0 }
  0xf6   : > { %v878_v17 = vpop.f32.mrf.mxu1 }
  0xfe   : > { %v1154_v12 = vpop.permute.xlu2 %1153 }
  0xff   : > { %1682 = vmatmul.msk.bf16.vlgmr.msra.gmra.mxu2 %vm1019_vm2, %v1154_v12  ;;  %1690 = vmatmul.msk.bf16.vlgmr.msra.gmra.mxu3 %vm1019_vm2, %v1154_v12 }
 0x106   : > { %v2090_v21 = vpop.permute.xlu2 %921 }
 0x107   : > { %v960_v19 = vmul.f32 %v2090_v21, %v868_v7 }
 0x109   : > { %v976_v31 = vadd.f32 %v960_v19, %v828_v18  ;;  %v880_v19 = vpop.f32.mrf.mxu1 }
 0x10b   : > { %v995_v34 = vadd.f32 %v1965_v37, %v976_v31 }
 0x10d   : > { %v1011_v41 = vmax.f32 %v995_v34, 0.0 }
 0x10e   : > { %v1156_v44 = vpop.permute.xlu2 %1155 }
 0x10f   : > { %1683 = vmatmul.msk.bf16.gmra.mxu2 %vm1019_vm2, %v1156_v44  ;;  %1691 = vmatmul.msk.bf16.gmra.mxu3 %vm1019_vm2, %v1156_v44  ;;  %v1056_v46 = vsel %vm1019_vm2, %v1011_v41, 0.0  ;;  %v1141_v48 = vpack.c.bf16 %v1012_v33, %v1011_v41  ;;  %v2137_v44 = vpop.permute.xlu0 %941 }
 0x110   : > { %v1058_v52 = vadd.f32 %v1057_v40, %v1056_v46  ;;  %v1496_v46 = vpack.c.bf16 %v631_v45, %v631_v45  ;;  %v965_v53 = vmul.f32 %v2137_v44, %v880_v19 }
 0x111   : > { %1161 = vrot.lane.b32.xlu1 %v1141_v48, %s1773_s28  ;;  %v883_v40 = vpop.f32.mrf.mxu1 }
 0x112   : > { %v1059_v55 = vrot.slane %v1058_v52, 4  ;;  %1706 = vmatmul.msk.bf16.vlgmr.msrb.gmra.mxu0 %vm1512_vm8, %v1496_v46 }
 0x114   : > { %v1060_v29 = vadd.f32 %v1059_v55, %v1058_v52  ;;  %v1066_v55 = vsel %vm1019_vm2, %v1014_v10, 0.0 }
 0x116   : > { %v1061_v28 = vrot.slane %v1060_v29, 2  ;;  %v2109_v23 = vpop.permute.xlu2 %929 }
 0x117   : > { %v962_v61 = vmul.f32 %v2109_v23, %v873_v16  ;;  %v730_v16 = vpop.f32.mrf.mxu0 }
 0x118   : > { %v1062_v62 = vadd.f32 %v1061_v28, %v1060_v29  ;;  %v2148_v28 = vpop.permute.xlu0 %817 }
 0x119   : > { %v978_v1 = vadd.f32 %v962_v61, %v830_v57  ;;  %v885_v2 = vpop.f32.mrf.mxu1 }
 0x11a   : > { %v1063_v3 = vrot.slane %v1062_v62, 1 }
 0x11b   : > { %v997_v7 = vadd.f32 %v1965_v37, %v978_v1 }
 0x11c   : > { %v1064_v8 = vadd.f32 %v1063_v3, %v1062_v62 }
 0x11d   : > { %v1013_v11 = vmax.f32 %v997_v7, 0.0 }
 0x11e   : > { %v1099_v6 = vmul.f32 %v2025_v56, %v1064_v8 }
 0x11f   : > { %v1142_v50 = vpack.c.bf16 %v1014_v10, %v1013_v11  ;;  %v2119_v18 = vpop.permute.xlu2 %802  ;;  %v732_v20 = vpop.f32.mrf.mxu0  ;;  %v1065_v29 = vsel %vm1019_vm2, %v1013_v11, 0.0 }
 0x120   : > { %v1120_v12 = vrot.slane %v1099_v6, 4  ;;  %v832_v33 = vmul.f32 %v2119_v18, %v730_v16  ;;  %v1067_v1 = vadd.f32 %v1066_v55, %v1065_v29 }
 0x121   : > { %1163 = vrot.lane.b32.xlu2 %v1142_v50, %s1773_s28 }
 0x122   : > { %v2117_v14 = vsel %vm1121_vm7, %v1120_v12, %v1119_v4  ;;  %v1068_v16 = vrot.slane %v1067_v1, 4 }
 0x127   : > { %v735_v4 = vpop.f32.mrf.mxu0 }
 0x128   : > { %v2122_v25 = vpop.permute.xlu2 %937 }
 0x129   : > { %v964_v34 = vmul.f32 %v2122_v25, %v878_v17 }
 0x12b   : > { %v980_v43 = vadd.f32 %v964_v34, %v832_v33  ;;  %v1721_v33 = vld [vmem:[%s2318_s14 + $0x8] sm:$0xff] }
 0x12c   : > { %1555 = vmatpush.bf16.msrb.mxu1 %v1721_v33 }
 0x12d   : > { %v999_v52 = vadd.f32 %v1965_v37, %v980_v43 }
 0x12f   : > { %v737_v61 = vpop.f32.mrf.mxu0  ;;  %v1015_v62 = vmax.f32 %v999_v52, 0.0 }
 0x130   : > { %v835_v6 = vmul.f32 %v2148_v28, %v737_v61 }
 0x131   : > { %v2135_v41 = vpop.permute.xlu2 %812  ;;  %v1074_v10 = vsel %vm1019_vm2, %v1015_v62, 0.0 }
 0x132   : > { %v834_v45 = vmul.f32 %v2135_v41, %v735_v4 }
 0x136   : > { %v1158_v31 = vpop.permute.xlu1 %1157 }
 0x137   : > { %1684 = vmatmul.msk.bf16.gmra.mxu2 %vm1019_vm2, %v1158_v31  ;;  %1692 = vmatmul.msk.bf16.gmra.mxu3 %vm1019_vm2, %v1158_v31  ;;  %v1069_v31 = vadd.f32 %v1068_v16, %v1067_v1 }
 0x13a   : > { %v2150_v3 = vpop.permute.xlu2 %949 }
 0x13b   : > { %v967_v50 = vmul.f32 %v2150_v3, %v885_v2 }
 0x13d   : > { %v983_v19 = vadd.f32 %v967_v50, %v835_v6 }
 0x13e   : > { %v2139_v48 = vpop.permute.xlu1 %807 }
 0x13f   : > { %v833_v54 = vmul.f32 %v2139_v48, %v732_v20  ;;  %v1002_v46 = vadd.f32 %v1965_v37, %v983_v19 }
 0x141   : > { %v981_v57 = vadd.f32 %v965_v53, %v833_v54  ;;  %v1070_v53 = vrot.slane %v1069_v31, 2  ;;  %v1018_v29 = vmax.f32 %v1002_v46, 0.0 }
 0x143   : > { %v1000_v60 = vadd.f32 %v1965_v37, %v981_v57  ;;  %v1084_v1 = vsel %vm1019_vm2, %v1018_v29, 0.0 }
 0x145   : > { %v1016_v7 = vmax.f32 %v1000_v60, 0.0  ;;  %v1071_v60 = vadd.f32 %v1070_v53, %v1069_v31 }
 0x146   : > { %v1160_v8 = vpop.permute.xlu1 %1159 }
 0x147   : > { %1685 = vmatmul.msk.bf16.gmra.mxu2 %vm1019_vm2, %v1160_v8  ;;  %1693 = vmatmul.msk.bf16.gmra.mxu3 %vm1019_vm2, %v1160_v8  ;;  %v1143_v11 = vpack.c.bf16 %v1016_v7, %v1015_v62  ;;  %v1075_v12 = vsel %vm1019_vm2, %v1016_v7, 0.0  ;;  %v1072_v4 = vrot.slane %v1071_v60, 1 }
 0x148   : > { %v1076_v17 = vadd.f32 %v1075_v12, %v1074_v10 }
 0x149   : > { %1165 = vrot.lane.b32.xlu0 %v1143_v11, %s1773_s28  ;;  %v1073_v10 = vadd.f32 %v1072_v4, %v1071_v60 }
 0x14a   : > { %v1077_v20 = vrot.slane %v1076_v17, 4 }
 0x14c   : > { %v1078_v34 = vadd.f32 %v1077_v20, %v1076_v17 }
 0x14e   : > { %v2162_v43 = vpop.permute.xlu1 %945  ;;  %v1079_v54 = vrot.slane %v1078_v34, 2 }
 0x14f   : > { %v966_v52 = vmul.f32 %v2162_v43, %v883_v40 }
 0x150   : > { %v1080_v62 = vadd.f32 %v1079_v54, %v1078_v34 }
 0x151   : > { %v982_v55 = vadd.f32 %v966_v52, %v834_v45 }
 0x152   : > { %v1081_v6 = vrot.slane %v1080_v62, 1 }
 0x153   : > { %v1001_v57 = vadd.f32 %v1965_v37, %v982_v55  ;;  %v1100_v37 = vmul.f32 %v2025_v56, %v1073_v10 }
 0x154   : > { %v1082_v11 = vadd.f32 %v1081_v6, %v1080_v62 }
 0x155   : > { %v1017_v61 = vmax.f32 %v1001_v57, 0.0  ;;  %v1123_v31 = vrot.slane %v1100_v37, 3 }
 0x156   : > { %v1101_v17 = vmul.f32 %v2025_v56, %v1082_v11 }
 0x157   : > { %v1083_v2 = vsel %vm1019_vm2, %v1017_v61, 0.0  ;;  %v1144_v7 = vpack.c.bf16 %v1018_v29, %v1017_v61  ;;  %v1125_v45 = vsel %vm1124_vm9, %v1123_v31, %v2117_v14  ;;  %v2186_v61 = vld [vmem:[%s2313_s9] ss:$0 sm:$0xff] }
 0x158   : > { %v1085_v8 = vadd.f32 %v1084_v1, %v1083_v2  ;;  %v1126_v33 = vrot.slane %v1101_v17, 2 }
 0x159   : > { %1167 = vrot.lane.b32.xlu1 %v1144_v7, %s1773_s28  ;;  %s609_s28 = scalar_lea.vmem %s2328_s30, %s2125_s24 }
 0x15a   : > { %v1086_v40 = vrot.slane %v1085_v8, 4  ;;  %v1128_v52 = vsel %vm1127_vm10, %v1126_v33, %v1125_v45 }
 0x15c   : > { %v1087_v50 = vadd.f32 %v1086_v40, %v1085_v8 }
 0x15e   : > { %v1088_v12 = vrot.slane %v1087_v50, 2 }
 0x160   : > { %v1089_v16 = vadd.f32 %v1088_v12, %v1087_v50 }
 0x162   : > { %v1090_v20 = vrot.slane %v1089_v16, 1 }
 0x164   : > { %v1091_v19 = vadd.f32 %v1090_v20, %v1089_v16 }
 0x166   : > { %v1102_v34 = vmul.f32 %v2025_v56, %v1091_v19 }
 0x168   : > { %v1129_v46 = vrot.slane %v1102_v34, 1 }
 0x16a   : > { %v1131_v53 = vsel %vm1130_vm11, %v1129_v46, %v1128_v52 }
 0x16b   : > { %v1133_v54 = vsel %vm1019_vm2, %v1131_v53, 0.0 }
 0x16c   : > { %1134 = vadd.xlane.f32.xlu2 %v1133_v54 }
 0x17b   : > { %v1164_v10 = vpop.permute.xlu2 %1163 }
 0x182   : > { %v1206_v55 = vpop.f32.mrf.mxu2  ;;  %v1274_v29 = vpop.f32.mrf.mxu3 }
 0x183   : > { %v1246_v57 = vmul.f32 %v1206_v55, %v1943_v26  ;;  %v1314_v60 = vmul.f32 %v1274_v29, %v1945_v27  ;;  %v1162_v56 = vpop.permute.xlu1 %1161 }
 0x184   : > { %1686 = vmatmul.msk.bf16.gmra.mxu2 %vm1019_vm2, %v1162_v56  ;;  %1694 = vmatmul.msk.bf16.gmra.mxu3 %vm1019_vm2, %v1162_v56 }
 0x185   : > { %v1330_v14 = vadd.f32 %v1314_v60, %v1246_v57 }
 0x187   : > { %v1349_v2 = vadd.f32 %v2186_v61, %v1330_v14 }
 0x189   : > { %v1365_v8 = vmax.f32 %v1349_v2, 0.0 }
 0x18a   : > { %v1208_v62 = vpop.f32.mrf.mxu2  ;;  %v1276_v1 = vpop.f32.mrf.mxu3 }
 0x18b   : > { %v1247_v7 = vmul.f32 %v1208_v62, %v1967_v38  ;;  %v1315_v26 = vmul.f32 %v1276_v1, %v1970_v39  ;;  %v1382_v11 = vsel %vm1381_vm12, %v1365_v8, 0.0  ;;  %v1720_v39 = vld [vmem:[%s2318_s14] sm:$0xff] }
 0x18c   : > { %1556 = vmatpush.bf16.msrb.mxu1 %v1720_v39 }
 0x18d   : > { %v1331_v27 = vadd.f32 %v1315_v26, %v1247_v7  ;;  %v2210_v7 = vld [vmem:[%s2314_s10] ss:$0 sm:$0xff] }
 0x18f   : > { %v1350_v4 = vadd.f32 %v2186_v61, %v1331_v27 }
 0x191   : > { %v1366_v6 = vmax.f32 %v1350_v4, 0.0 }
 0x192   : > { %v1211_v40 = vpop.f32.mrf.mxu2  ;;  %v1279_v50 = vpop.f32.mrf.mxu3 }
 0x193   : > { %v1383_v12 = vsel %vm1381_vm12, %v1366_v6, 0.0  ;;  %v1248_v16 = vmul.f32 %v1211_v40, %v1960_v35  ;;  %v1316_v37 = vmul.f32 %v1279_v50, %v1984_v51 }
 0x194   : > { %v1384_v38 = vadd.f32 %v1383_v12, %v1382_v11  ;;  %1687 = vmatmul.msk.bf16.gmra.mxu2 %vm1019_vm2, %v1164_v10  ;;  %1695 = vmatmul.msk.bf16.gmra.mxu3 %vm1019_vm2, %v1164_v10 }
 0x195   : > { %v1332_v17 = vadd.f32 %v1316_v37, %v1248_v16 }
 0x196   : > { %v1385_v51 = vrot.slane %v1384_v38, 4 }
 0x197   : > { %v1351_v31 = vadd.f32 %v2186_v61, %v1332_v17 }
 0x198   : > { %v1386_v52 = vadd.f32 %v1385_v51, %v1384_v38 }
 0x199   : > { %v1367_v45 = vmax.f32 %v1351_v31, 0.0 }
 0x19a   : > { %v1213_v20 = vpop.f32.mrf.mxu2  ;;  %v1281_v19 = vpop.f32.mrf.mxu3  ;;  %v1387_v29 = vrot.slane %v1386_v52, 2 }
 0x19b   : > { %v1249_v33 = vmul.f32 %v1213_v20, %v1975_v47  ;;  %v1317_v35 = vmul.f32 %v1281_v19, %v1999_v0  ;;  %v1391_v54 = vsel %vm1381_vm12, %v1367_v45, 0.0 }
 0x19c   : > { %v1388_v56 = vadd.f32 %v1387_v29, %v1386_v52 }
 0x19d   : > { %v1333_v34 = vadd.f32 %v1317_v35, %v1249_v33 }
 0x19e   : > { %v1389_v47 = vrot.slane %v1388_v56, 1 }
 0x19f   : > { %v1352_v46 = vadd.f32 %v2186_v61, %v1333_v34 }
 0x1a0   : > { %v1390_v2 = vadd.f32 %v1389_v47, %v1388_v56 }
 0x1a1   : > { %v1368_v53 = vmax.f32 %v1352_v46, 0.0 }
 0x1a2   : > { %v1457_v8 = vmul.f32 %v2210_v7, %v1390_v2 }
 0x1a3   : > { %v1392_v55 = vsel %vm1381_vm12, %v1368_v53, 0.0 }
 0x1a4   : > { %v1393_v57 = vadd.f32 %v1392_v55, %v1391_v54 }
 0x1a6   : > { %v1394_v60 = vrot.slane %v1393_v57, 4 }
 0x1a8   : > { %v1395_v14 = vadd.f32 %v1394_v60, %v1393_v57 }
 0x1aa   : > { %v1396_v62 = vrot.slane %v1395_v14, 2 }
 0x1ac   : > { %v1397_v1 = vadd.f32 %v1396_v62, %v1395_v14 }
 0x1ae   : > { %v1398_v0 = vrot.slane %v1397_v1, 1 }
 0x1b0   : > { %v1399_v26 = vadd.f32 %v1398_v0, %v1397_v1 }
 0x1b2   : > { %v1458_v27 = vmul.f32 %v2210_v7, %v1399_v26 }
 0x1b4   : > { %v1473_v4 = vrot.slane %v1458_v27, 7 }
 0x1b6   : > { %v1474_v6 = vsel %vm1112_vm4, %v1473_v4, %v1457_v8 }
 0x1ba   : > { %v1216_v40 = vpop.f32.mrf.mxu2  ;;  %v1284_v50 = vpop.f32.mrf.mxu3 }
 0x1bb   : > { %v1250_v10 = vmul.f32 %v1216_v40, %v1996_v63  ;;  %v1318_v11 = vmul.f32 %v1284_v50, %v2006_v13  ;;  %v1166_v12 = vpop.permute.xlu0 %1165  ;;  %v1758_v63 = vld [vmem:[%s2317_s13] ss:$0 sm:$0xff]  ;;  %v1525_v13 = vpop.f32.mrf.mxu0 }
 0x1bc   : > { %1688 = vmatmul.msk.bf16.gmra.mxu2 %vm1019_vm2, %v1166_v12  ;;  %1696 = vmatmul.msk.bf16.gmra.mxu3 %vm1019_vm2, %v1166_v12  ;;  %v1526_v31 = vadd.f32 %v1758_v63, %v1525_v13 }
 0x1bd   : > { %v1334_v16 = vadd.f32 %v1318_v11, %v1250_v10 }
 0x1be   : > { %v1529_v51 = vmax.f32 %v1526_v31, 0.0 }
 0x1bf   : > { %v1353_v39 = vadd.f32 %v2186_v61, %v1334_v16 }
 0x1c0   : > { %v1530_v52 = vpack.c.bf16 %v1529_v51, %v1529_v51 }
 0x1c1   : > { %v1369_v33 = vmax.f32 %v1353_v39, 0.0 }
 0x1c2   : > { %v1218_v37 = vpop.f32.mrf.mxu2  ;;  %v1286_v38 = vpop.f32.mrf.mxu3  ;;  %1715 = vmatmul.msk.bf16.vlgmr.msrb.gmra.mxu1 %vm1512_vm8, %v1530_v52 }
 0x1c3   : > { %v1251_v17 = vmul.f32 %v1218_v37, %v2013_v30  ;;  %v1319_v20 = vmul.f32 %v1286_v38, %v2015_v32  ;;  %v1400_v53 = vsel %vm1381_vm12, %v1369_v33, 0.0  ;;  %v1527_v60 = vpop.f32.mrf.mxu0 }
 0x1c5   : > { %v1335_v19 = vadd.f32 %v1319_v20, %v1251_v17 }
 0x1c7   : > { %v1354_v35 = vadd.f32 %v2186_v61, %v1335_v19 }
 0x1c9   : > { %v1370_v34 = vmax.f32 %v1354_v35, 0.0 }
 0x1ca   : > { %v1221_v45 = vpop.f32.mrf.mxu2  ;;  %v1289_v46 = vpop.f32.mrf.mxu3 }
 0x1cb   : > { %v1401_v30 = vsel %vm1381_vm12, %v1370_v34, 0.0  ;;  %v1252_v32 = vmul.f32 %v1221_v45, %v2027_v58  ;;  %v1320_v54 = vmul.f32 %v1289_v46, %v2029_v59  ;;  %v1168_v55 = vpop.permute.xlu1 %1167 }
 0x1cc   : > { %v1402_v29 = vadd.f32 %v1401_v30, %v1400_v53  ;;  %1689 = vmatmul.msk.bf16.gmra.mxu2 %vm1019_vm2, %v1168_v55  ;;  %1697 = vmatmul.msk.bf16.gmra.mxu3 %vm1019_vm2, %v1168_v55 }
 0x1cd   : > { %v1336_v57 = vadd.f32 %v1320_v54, %v1252_v32 }
 0x1ce   : > { %v1403_v56 = vrot.slane %v1402_v29, 4 }
 0x1cf   : > { %v1355_v0 = vadd.f32 %v2186_v61, %v1336_v57 }
 0x1d0   : > { %v1404_v14 = vadd.f32 %v1403_v56, %v1402_v29 }
 0x1d1   : > { %v1371_v8 = vmax.f32 %v1355_v0, 0.0 }
 0x1d2   : > { %v1405_v62 = vrot.slane %v1404_v14, 2  ;;  %v1223_v47 = vpop.f32.mrf.mxu2  ;;  %v1291_v1 = vpop.f32.mrf.mxu3 }
 0x1d3   : > { %v1253_v58 = vmul.f32 %v1223_v47, %v2052_v22  ;;  %v1321_v59 = vmul.f32 %v1291_v1, %v2054_v24  ;;  %v1409_v11 = vsel %vm1381_vm12, %v1371_v8, 0.0 }
 0x1d4   : > { %v1406_v2 = vadd.f32 %v1405_v62, %v1404_v14 }
 0x1d5   : > { %v1337_v26 = vadd.f32 %v1321_v59, %v1253_v58 }
 0x1d6   : > { %v1407_v27 = vrot.slane %v1406_v2, 1 }
 0x1d7   : > { %v1356_v4 = vadd.f32 %v2186_v61, %v1337_v26 }
 0x1d8   : > { %v1408_v40 = vadd.f32 %v1407_v27, %v1406_v2 }
 0x1d9   : > { %v1372_v50 = vmax.f32 %v1356_v4, 0.0 }
 0x1da   : > { %v1459_v10 = vmul.f32 %v2210_v7, %v1408_v40 }
 0x1db   : > { %v1410_v12 = vsel %vm1381_vm12, %v1372_v50, 0.0 }
 0x1dc   : > { %v1475_v16 = vrot.slane %v1459_v10, 6  ;;  %v1411_v37 = vadd.f32 %v1410_v12, %v1409_v11  ;;  %v1759_v11 = vld [vmem:[%s2319_s15] ss:$0 sm:$0xff] }
 0x1de   : > { %v1412_v38 = vrot.slane %v1411_v37, 4  ;;  %v1476_v22 = vsel %vm1115_vm5, %v1475_v16, %v1474_v6 }
 0x1e0   : > { %v1413_v24 = vadd.f32 %v1412_v38, %v1411_v37 }
 0x1e2   : > { %v1414_v39 = vrot.slane %v1413_v24, 2 }
 0x1e4   : > { %v1415_v17 = vadd.f32 %v1414_v39, %v1413_v24 }
 0x1e6   : > { %v1416_v20 = vrot.slane %v1415_v17, 1 }
 0x1e8   : > { %v1417_v63 = vadd.f32 %v1416_v20, %v1415_v17 }
 0x1ea   : > { %v1460_v19 = vmul.f32 %v2210_v7, %v1417_v63 }
 0x1ec   : > { %v1477_v13 = vrot.slane %v1460_v19, 5 }
 0x1ee   : > { %v2243_v31 = vsel %vm1118_vm6, %v1477_v13, %v1476_v22 }
 0x207   : > { %v1226_v33 = vpop.f32.mrf.mxu2  ;;  %v1294_v35 = vpop.f32.mrf.mxu3 }
 0x208   : > { %v1254_v32 = vmul.f32 %v1226_v33, %v2078_v9  ;;  %v1322_v54 = vmul.f32 %v1294_v35, %v2090_v21 }
 0x20a   : > { %v1338_v14 = vadd.f32 %v1322_v54, %v1254_v32 }
 0x20f   : > { %v1228_v51 = vpop.f32.mrf.mxu2  ;;  %v1296_v34 = vpop.f32.mrf.mxu3 }
 0x210   : > { %v1255_v52 = vmul.f32 %v1228_v51, %v2076_v5  ;;  %v1323_v6 = vmul.f32 %v1296_v34, %v2080_v49 }
 0x212   : > { %v1339_v57 = vadd.f32 %v1323_v6, %v1255_v52 }
 0x214   : > { %v1358_v5 = vadd.f32 %v2186_v61, %v1339_v57 }
 0x216   : > { %v1374_v0 = vmax.f32 %v1358_v5, 0.0 }
 0x217   : > { %v1231_v45 = vpop.f32.mrf.mxu2  ;;  %v1299_v46 = vpop.f32.mrf.mxu3 }
 0x218   : > { %v1256_v60 = vmul.f32 %v1231_v45, %v2086_v15  ;;  %v1324_v56 = vmul.f32 %v1299_v46, %v2109_v23  ;;  %v1419_v2 = vsel %vm1381_vm12, %v1374_v0, 0.0 }
 0x21a   : > { %v1340_v1 = vadd.f32 %v1324_v56, %v1256_v60 }
 0x21c   : > { %v1359_v15 = vadd.f32 %v2186_v61, %v1340_v1 }
 0x21e   : > { %v1375_v8 = vmax.f32 %v1359_v15, 0.0 }
 0x21f   : > { %v1233_v53 = vpop.f32.mrf.mxu2  ;;  %v1301_v30 = vpop.f32.mrf.mxu3 }
 0x220   : > { %v1257_v55 = vmul.f32 %v1233_v53, %v2097_v36  ;;  %v1325_v29 = vmul.f32 %v1301_v30, %v2100_v42  ;;  %v1357_v36 = vadd.f32 %v2186_v61, %v1338_v14  ;;  %v1427_v37 = vsel %vm1381_vm12, %v1375_v8, 0.0  ;;  %v1760_v53 = vld [vmem:[%s2320_s16] ss:$0 sm:$0xff] }
 0x222   : > { %v1341_v62 = vadd.f32 %v1325_v29, %v1257_v55  ;;  %v1373_v23 = vmax.f32 %v1357_v36, 0.0 }
 0x224   : > { %v1360_v42 = vadd.f32 %v2186_v61, %v1341_v62  ;;  %v1418_v40 = vsel %vm1381_vm12, %v1373_v23, 0.0 }
 0x225   : > { %v1420_v16 = vadd.f32 %v1419_v2, %v1418_v40 }
 0x226   : > { %v1376_v59 = vmax.f32 %v1360_v42, 0.0 }
 0x228   : > { %v1428_v50 = vsel %vm1381_vm12, %v1376_v59, 0.0 }
 0x229   : > { %v1429_v24 = vadd.f32 %v1428_v50, %v1427_v37 }
 0x22b   : > { %v1430_v35 = vrot.slane %v1429_v24, 4 }
 0x22d   : > { %v1431_v30 = vadd.f32 %v1430_v35, %v1429_v24 }
 0x22f   : > { %v1432_v14 = vrot.slane %v1431_v30, 2 }
 0x23f   : > { %v1236_v49 = vpop.f32.mrf.mxu2  ;;  %v1304_v47 = vpop.f32.mrf.mxu3 }
 0x240   : > { %v1258_v9 = vmul.f32 %v1236_v49, %v2119_v18  ;;  %v1326_v21 = vmul.f32 %v1304_v47, %v2122_v25  ;;  %v1558_v12 = vpop.f32.mrf.mxu1 }
 0x241   : > { %v1559_v39 = vadd.f32 %v1759_v11, %v1558_v12 }
 0x242   : > { %v1342_v58 = vadd.f32 %v1326_v21, %v1258_v9  ;;  %v1433_v9 = vadd.f32 %v1432_v14, %v1431_v30 }
 0x243   : > { %v1562_v34 = vmax.f32 %v1559_v39, 0.0 }
 0x244   : > { %v1361_v4 = vadd.f32 %v2186_v61, %v1342_v58 }
 0x245   : > { %v1566_v54 = vmul.f32 %v1760_v53, %v1562_v34 }
 0x246   : > { %v1377_v38 = vmax.f32 %v1361_v4, 0.0 }
 0x247   : > { %v1238_v26 = vpop.f32.mrf.mxu2  ;;  %v1306_v27 = vpop.f32.mrf.mxu3  ;;  %v1568_v56 = vsel %vm1567_vm13, %v1566_v54, 0.0 }
 0x248   : > { %v1259_v18 = vmul.f32 %v1238_v26, %v2139_v48  ;;  %v1327_v25 = vmul.f32 %v1306_v27, %v2137_v44  ;;  %v1421_v44 = vrot.slane %v1420_v16, 4  ;;  %v1436_v63 = vsel %vm1381_vm12, %v1377_v38, 0.0  ;;  %v1560_v45 = vpop.f32.mrf.mxu1  ;;  %1569 = vadd.xlane.f32.xlu1 %v1568_v56 }
 0x24a   : > { %v1343_v10 = vadd.f32 %v1327_v25, %v1259_v18  ;;  %v1422_v46 = vadd.f32 %v1421_v44, %v1420_v16  ;;  %v1135_v44 = vpop.xlane.xlu2 %1134 }
 0x24c   : > { %v1362_v22 = vadd.f32 %v2186_v61, %v1343_v10  ;;  %v1423_v55 = vrot.slane %v1422_v46, 2 }
 0x24e   : > { %v1378_v48 = vmax.f32 %v1362_v22, 0.0  ;;  %v1424_v49 = vadd.f32 %v1423_v55, %v1422_v46 }
 0x24f   : > { %v1241_v17 = vpop.f32.mrf.mxu2  ;;  %v1309_v20 = vpop.f32.mrf.mxu3 }
 0x250   : > { %v1437_v19 = vsel %vm1381_vm12, %v1378_v48, 0.0  ;;  %v1260_v13 = vmul.f32 %v1241_v17, %v2135_v41  ;;  %v1328_v33 = vmul.f32 %v1309_v20, %v2162_v43  ;;  %v1425_v42 = vrot.slane %v1424_v49, 1  ;;  %v1761_v17 = vld [vmem:[#allocation2] ss:$0 sm:$0xff] }
 0x251   : > { %v1438_v51 = vadd.f32 %v1437_v19, %v1436_v63  ;;  %v632_v19 = vld [vmem:[%s609_s28] sm:$0xff] }
 0x252   : > { %v1344_v6 = vadd.f32 %v1328_v33, %v1260_v13  ;;  %v1426_v59 = vadd.f32 %v1425_v42, %v1424_v49 }
 0x253   : > { %v1439_v52 = vrot.slane %v1438_v51, 4 }
 0x254   : > { %v1363_v43 = vadd.f32 %v2186_v61, %v1344_v6  ;;  %v1461_v4 = vmul.f32 %v2210_v7, %v1426_v59 }
 0x255   : > { %v1440_v32 = vadd.f32 %v1439_v52, %v1438_v51 }
 0x256   : > { %v1379_v47 = vmax.f32 %v1363_v43, 0.0  ;;  %v1479_v50 = vrot.slane %v1461_v4, 4 }
 0x257   : > { %v1243_v29 = vpop.f32.mrf.mxu2  ;;  %v1311_v41 = vpop.f32.mrf.mxu3  ;;  %v1441_v62 = vrot.slane %v1440_v32, 2 }
 0x258   : > { %v1261_v57 = vmul.f32 %v1243_v29, %v2148_v28  ;;  %v1329_v60 = vmul.f32 %v1311_v41, %v2150_v3  ;;  %v1445_v0 = vsel %vm1381_vm12, %v1379_v47, 0.0  ;;  %v1434_v28 = vrot.slane %v1433_v9, 1 }
 0x259   : > { %v1442_v21 = vadd.f32 %v1441_v62, %v1440_v32  ;;  %v1480_v37 = vsel %vm1121_vm7, %v1479_v50, %v2243_v31 }
 0x25a   : > { %v1345_v5 = vadd.f32 %v1329_v60, %v1261_v57  ;;  %v1435_v26 = vadd.f32 %v1434_v28, %v1433_v9 }
 0x25b   : > { %v1443_v3 = vrot.slane %v1442_v21, 1 }
 0x25c   : > { %v1364_v1 = vadd.f32 %v2186_v61, %v1345_v5  ;;  %v1462_v18 = vmul.f32 %v2210_v7, %v1435_v26 }
 0x25d   : > { %v1444_v27 = vadd.f32 %v1443_v3, %v1442_v21 }
 0x25e   : > { %v1380_v36 = vmax.f32 %v1364_v1, 0.0  ;;  %v1481_v11 = vrot.slane %v1462_v18, 3 }
 0x25f   : > { %v1463_v25 = vmul.f32 %v2210_v7, %v1444_v27 }
 0x260   : > { %v1446_v15 = vsel %vm1381_vm12, %v1380_v36, 0.0  ;;  %v1482_v38 = vsel %vm1124_vm9, %v1481_v11, %v1480_v37 }
 0x261   : > { %v1447_v58 = vadd.f32 %v1446_v15, %v1445_v0  ;;  %v1483_v12 = vrot.slane %v1463_v25, 2 }
 0x263   : > { %v1448_v23 = vrot.slane %v1447_v58, 4  ;;  %v1484_v24 = vsel %vm1127_vm10, %v1483_v12, %v1482_v38 }
 0x265   : > { %v1449_v2 = vadd.f32 %v1448_v23, %v1447_v58 }
 0x267   : > { %v1450_v8 = vrot.slane %v1449_v2, 2 }
 0x269   : > { %v1451_v61 = vadd.f32 %v1450_v8, %v1449_v2 }
 0x26b   : > { %v1452_v40 = vrot.slane %v1451_v61, 1 }
 0x26d   : > { %v1453_v10 = vadd.f32 %v1452_v40, %v1451_v61 }
 0x26f   : > { %v1464_v16 = vmul.f32 %v2210_v7, %v1453_v10  ;;  %v1762_v7 = vld [vmem:[#allocation3] ss:$0 sm:$0xff] }
 0x271   : > { %v1485_v22 = vrot.slane %v1464_v16, 1 }
 0x273   : > { %v1486_v48 = vsel %vm1130_vm11, %v1485_v22, %v1484_v24 }
 0x274   : > { %v1488_v39 = vsel %vm1381_vm12, %v1486_v48, 0.0 }
 0x275   : > { %1489 = vadd.xlane.f32.xlu0 %v1488_v39 }
 0x2bb   : > { %v1570_v31 = vpop.xlane.xlu1 %1569 }
 0x2bc   : > { %v1574_v33 = vadd.f32 %v1762_v7, %v1570_v31 }
 0x2e8   : > { %v1490_v20 = vpop.xlane.xlu0 %1489 }
 0x2e9   : > { %v1491_v63 = vadd.f32 %v1490_v20, %v1135_v44 }
 0x2eb   : > { %v1495_v13 = vadd.f32 %v1761_v17, %v1491_v63 }
 0x2ed   : > { %v1575_v35 = vadd.f32 %v1495_v13, %v632_v19 }
 0x2ef   : > { %v1576_v51 = vadd.f32 %v1575_v35, %v1574_v33 }
 0x2f1   : > { %1578 = vst.msk [vmem:[%s613_s1] sm:$0xff] %vm1577_vm14, %v1576_v51 }
 0x2f2 PF: > { %s32_s0 = sadd.s32 1, %s1769_s0  }
 0x2f3   : > { %p29_p5 = scmp.ge.s32.totalorder %s32_s0, 4  }
 0x2f5   :  { %31 = sbr.rel (!%p29_p5) target bundleno = 4 (0x4), region = 128 }

</bundles_post_ra>
